<compile_context>
chip_gen: v6e
topology: v6e:2x2x1
jax: 0.10.0
libtpu: 0.0.40
codegen_flags: <defaults>
</compile_context>

<pallas_src>
import jax
import jax.numpy as jnp
from jax.experimental import pallas as pl
from jax.experimental.pallas import tpu as pltpu

INPUT_DIM = 273
HIDDEN = 500
OUTPUT_DIM = 112
BN_EPS = 1e-5

# lane-padded sizes
PAD_HID = 512     # 500 -> 512
PAD_OUT = 128     # 112 -> 128 (lane-dense output)
VEC_ROWS = 10     # b1,g1,be1, b2,g2,be2, b3,g3,be3, b4


def _generator_kernel(x_ref, w1_ref, w2_ref, w3_ref, w4_ref, vec_ref, o_ref):
    """One mini-batch per grid step; whole forward VMEM-resident."""
    n = x_ref.shape[0]
    inv_n = jnp.float32(1.0 / n)

    def lin_relu_bn(h_bf16, w_ref, row):
        b = vec_ref[row + 0:row + 1, :]     # (1, PAD_HID) f32
        g = vec_ref[row + 1:row + 2, :]
        be = vec_ref[row + 2:row + 3, :]
        # Linear: bf16 operands, f32 MXU accumulation; + bias.
        z = jnp.dot(h_bf16, w_ref[...],
                    preferred_element_type=jnp.float32) + b
        # ReLU (VPU).
        z = jnp.maximum(z, 0.0)
        # BatchNorm1d, biased batch stats, two-pass variance (VPU/XLU are idle
        # on this DMA-bound kernel, so the extra pass is free).
        mean = jnp.sum(z, axis=0, keepdims=True) * inv_n
        d = z - mean
        var = jnp.sum(d * d, axis=0, keepdims=True) * inv_n
        scale = g * jax.lax.rsqrt(var + BN_EPS)          # EUP
        shift = be - mean * scale
        # Folded affine: one mul + one add on the (N, PAD_HID) tensor.
        return (z * scale + shift).astype(jnp.bfloat16)

    # In-kernel cast of the raw (N, 273) f32 input; Mosaic pads the 273-wide
    # contraction against the (273, PAD_HID) weight internally.
    h = x_ref[...].astype(jnp.bfloat16)
    h = lin_relu_bn(h, w1_ref, 0)
    h = lin_relu_bn(h, w2_ref, 3)
    h = lin_relu_bn(h, w3_ref, 6)
    # Final Linear(500 -> 112), lane-padded to 128.
    out = jnp.dot(h, w4_ref[...], preferred_element_type=jnp.float32)
    out = out + vec_ref[9:10, :PAD_OUT]
    o_ref[...] = out.astype(o_ref.dtype)


def _vmem_limit_bytes():
    """Generation-aware scoped-VMEM limit: ~96 MiB on 128 MiB parts
    (v5e/v6e), ~48 MiB on v7x (64 MiB per TensorCore)."""
    try:
        cap = int(pltpu.get_tpu_info().vmem_capacity_bytes)
    except Exception:
        cap = 64 * 1024 * 1024
    return min((cap * 3) // 4, 96 * 1024 * 1024)


def generator_forward(x, packed, out_dtype=jnp.float32):
    """x: (N, 273) f32 for one mini-batch, or (G, N, 273) f32 for G
    independent mini-batches (BatchNorm statistics are per mini-batch).
    packed: see pack_params()."""
    squeeze = x.ndim == 2
    if squeeze:
        x = x[None]
    g_dim, n, _ = x.shape

    def weight_spec(shape):
        # Constant block index -> weights DMA'd once, resident across the grid.
        return pl.BlockSpec(shape, lambda g: (0, 0))

    out = pl.pallas_call(
        _generator_kernel,
        out_shape=jax.ShapeDtypeStruct((g_dim, n, PAD_OUT), out_dtype),
        grid=(g_dim,),
        in_specs=[
            pl.BlockSpec((None, n, INPUT_DIM), lambda g: (g, 0, 0)),
            weight_spec((INPUT_DIM, PAD_HID)),
            weight_spec((PAD_HID, PAD_HID)),
            weight_spec((PAD_HID, PAD_HID)),
            weight_spec((PAD_HID, PAD_OUT)),
            weight_spec((VEC_ROWS, PAD_HID)),
        ],
        out_specs=pl.BlockSpec((None, n, PAD_OUT), lambda g: (g, 0, 0)),
        compiler_params=pltpu.CompilerParams(
            dimension_semantics=("parallel",),
            vmem_limit_bytes=_vmem_limit_bytes()),
    )(x, packed["w1"], packed["w2"], packed["w3"], packed["w4"], packed["vec"])

    out = out[..., :OUTPUT_DIM]
    return out[0] if squeeze else out


def init_params(key):
    """Synthetic params at the *logical* shapes; Linear weights stored
    pre-transposed as (in, out), f32 (mimics PyTorch uniform init)."""
    ks = jax.random.split(key, 8)

    def lin(kw, kb, fan_in, fan_out):
        bound = 1.0 / jnp.sqrt(jnp.float32(fan_in))
        w = jax.random.uniform(kw, (fan_in, fan_out), jnp.float32, -bound, bound)
        b = jax.random.uniform(kb, (fan_out,), jnp.float32, -bound, bound)
        return w, b

    w1, b1 = lin(ks[0], ks[1], INPUT_DIM, HIDDEN)
    w2, b2 = lin(ks[2], ks[3], HIDDEN, HIDDEN)
    w3, b3 = lin(ks[4], ks[5], HIDDEN, HIDDEN)
    w4, b4 = lin(ks[6], ks[7], HIDDEN, OUTPUT_DIM)

    ones = jnp.ones((HIDDEN,), jnp.float32)
    zeros = jnp.zeros((HIDDEN,), jnp.float32)
    return {
        "w1": w1, "b1": b1, "g1": ones, "be1": zeros,
        "w2": w2, "b2": b2, "g2": ones, "be2": zeros,
        "w3": w3, "b3": b3, "g3": ones, "be3": zeros,
        "w4": w4, "b4": b4,
    }


def pack_params(p):
    """bf16 lane-padded weights + one packed f32 slab for all small vectors.
    Padded rows/cols (and padded gamma/beta/bias lanes) are zero, so padded
    features stay exactly zero through every layer."""
    def pad_w(w, rin, rout):
        out = jnp.zeros((rin, rout), jnp.bfloat16)
        return out.at[:w.shape[0], :w.shape[1]].set(w.astype(jnp.bfloat16))

    vec = jnp.zeros((VEC_ROWS, PAD_HID), jnp.float32)
    rows = [p["b1"], p["g1"], p["be1"],
            p["b2"], p["g2"], p["be2"],
            p["b3"], p["g3"], p["be3"], p["b4"]]
    for i, r in enumerate(rows):
        vec = vec.at[i, :r.shape[0]].set(r)

    return {
        "w1": pad_w(p["w1"], INPUT_DIM, PAD_HID),   # (273, 512) — no zero rows shipped
        "w2": pad_w(p["w2"], PAD_HID, PAD_HID),
        "w3": pad_w(p["w3"], PAD_HID, PAD_HID),
        "w4": pad_w(p["w4"], PAD_HID, PAD_OUT),
        "vec": vec,                                  # (10, 512) f32 slab
    }


def _reference_forward(x2d, p):
    """Pure-JAX mirror of the kernel math (bf16 matmul operands, f32
    accumulation, two-pass biased variance, folded BN affine)."""
    def blk(h, w, b, g, be):
        z = jnp.dot(h.astype(jnp.bfloat16), w.astype(jnp.bfloat16),
                    preferred_element_type=jnp.float32) + b
        z = jnp.maximum(z, 0.0)
        m = jnp.mean(z, axis=0, keepdims=True)
        v = jnp.mean((z - m) ** 2, axis=0, keepdims=True)
        scale = g * jax.lax.rsqrt(v + BN_EPS)
        return (z * scale + (be - m * scale)).astype(jnp.bfloat16)

    h = blk(x2d, p["w1"], p["b1"], p["g1"], p["be1"])
    h = blk(h, p["w2"], p["b2"], p["g2"], p["be2"])
    h = blk(h, p["w3"], p["b3"], p["g3"], p["be3"])
    return jnp.dot(h, p["w4"].astype(jnp.bfloat16),
                   preferred_element_type=jnp.float32) + p["b4"]


if __name__ == "__main__":
    key = jax.random.PRNGKey(0)
    k_params, k_x = jax.random.split(key)

    params = init_params(k_params)
    packed = pack_params(params)

    num_batches, batch = 2, 16   # 2 independent mini-batches of 16 rows
    x = jax.random.normal(k_x, (num_batches, batch, INPUT_DIM), jnp.float32)

    out = jax.block_until_ready(generator_forward(x, packed))
    assert out.shape == (num_batches, batch, OUTPUT_DIM)

    ref = jnp.stack([_reference_forward(x[g], params)
                     for g in range(num_batches)])
    max_err = float(jnp.max(jnp.abs(out - ref)))
    assert jnp.allclose(out, ref, atol=2e-2, rtol=2e-2), max_err

    print("KERNEL_OK")
</pallas_src>

<mosaic_0001>
module attributes {stable_mosaic.version = 11 : i64} {
  func.func @_generator_kernel(%arg0: i32, %arg1: memref<1x16x273xf32, #tpu.memory_space<vmem>>, %arg2: memref<273x512xbf16, #tpu.memory_space<vmem>>, %arg3: memref<512x512xbf16, #tpu.memory_space<vmem>>, %arg4: memref<512x512xbf16, #tpu.memory_space<vmem>>, %arg5: memref<512x128xbf16, #tpu.memory_space<vmem>>, %arg6: memref<10x512xf32, #tpu.memory_space<vmem>>, %arg7: memref<1x16x128xf32, #tpu.memory_space<vmem>>) attributes {dimension_semantics = [#tpu.dimension_semantics<parallel>], iteration_bounds = array<i64: 2>, scalar_prefetch = 0 : i64, scratch_operands = 0 : i64, tpu.core_type = #tpu.core_type<tc>, window_params = [{transform_indices = @transform_0, window_bounds = array<i64: 1, 16, 273>}, {pipeline_mode = #tpu.pipeline_mode<synchronous>, transform_indices = @transform_1, window_bounds = array<i64: 273, 512>}, {pipeline_mode = #tpu.pipeline_mode<synchronous>, transform_indices = @transform_2, window_bounds = array<i64: 512, 512>}, {pipeline_mode = #tpu.pipeline_mode<synchronous>, transform_indices = @transform_3, window_bounds = array<i64: 512, 512>}, {pipeline_mode = #tpu.pipeline_mode<synchronous>, transform_indices = @transform_4, window_bounds = array<i64: 512, 128>}, {pipeline_mode = #tpu.pipeline_mode<synchronous>, transform_indices = @transform_5, window_bounds = array<i64: 10, 512>}, {transform_indices = @transform_6, window_bounds = array<i64: 1, 16, 128>}]} {
    %c0 = arith.constant 0 : index
    %c0_0 = arith.constant 0 : index
    %c0_1 = arith.constant 0 : index
    %0 = vector.load %arg1[%c0, %c0_0, %c0_1] : memref<1x16x273xf32, #tpu.memory_space<vmem>>, vector<1x16x273xf32>
    %1 = vector.shape_cast %0 : vector<1x16x273xf32> to vector<16x273xf32>
    %2 = arith.truncf %1 : vector<16x273xf32> to vector<16x273xbf16>
    %c0_2 = arith.constant 0 : index
    %c0_3 = arith.constant 0 : index
    %3 = vector.load %arg6[%c0_2, %c0_3] : memref<10x512xf32, #tpu.memory_space<vmem>>, vector<1x512xf32>
    %c1 = arith.constant 1 : index
    %c0_4 = arith.constant 0 : index
    %4 = vector.load %arg6[%c1, %c0_4] : memref<10x512xf32, #tpu.memory_space<vmem>>, vector<1x512xf32>
    %c2 = arith.constant 2 : index
    %c0_5 = arith.constant 0 : index
    %5 = vector.load %arg6[%c2, %c0_5] : memref<10x512xf32, #tpu.memory_space<vmem>>, vector<1x512xf32>
    %c0_6 = arith.constant 0 : index
    %c0_7 = arith.constant 0 : index
    %6 = vector.load %arg2[%c0_6, %c0_7] : memref<273x512xbf16, #tpu.memory_space<vmem>>, vector<273x512xbf16>
    %cst = arith.constant dense<0.000000e+00> : vector<16x512xf32>
    %7 = tpu.matmul %2, %6, %cst {dimension_numbers = #tpu.dot_dimension_numbers<[1], [0], [0], [1], [0, 0, 1, 1], [], []>} : vector<16x273xbf16>, vector<273x512xbf16>, vector<16x512xf32> -> vector<16x512xf32>
    %8 = vector.broadcast %3 : vector<1x512xf32> to vector<16x512xf32>
    %9 = arith.addf %7, %8 : vector<16x512xf32>
    %cst_8 = arith.constant 0.000000e+00 : f32
    %10 = vector.broadcast %cst_8 : f32 to vector<16x512xf32>
    %11 = arith.maximumf %9, %10 : vector<16x512xf32>
    %cst_9 = arith.constant dense<0.000000e+00> : vector<512xf32>
    %12 = vector.multi_reduction <add>, %11, %cst_9 [0] : vector<16x512xf32> to vector<512xf32>
    %13 = vector.shape_cast %12 : vector<512xf32> to vector<1x512xf32>
    %cst_10 = arith.constant 6.250000e-02 : f32
    %14 = vector.broadcast %cst_10 : f32 to vector<1x512xf32>
    %15 = arith.mulf %13, %14 : vector<1x512xf32>
    %16 = vector.broadcast %15 : vector<1x512xf32> to vector<16x512xf32>
    %17 = arith.subf %11, %16 : vector<16x512xf32>
    %18 = arith.mulf %17, %17 : vector<16x512xf32>
    %cst_11 = arith.constant dense<0.000000e+00> : vector<512xf32>
    %19 = vector.multi_reduction <add>, %18, %cst_11 [0] : vector<16x512xf32> to vector<512xf32>
    %20 = vector.shape_cast %19 : vector<512xf32> to vector<1x512xf32>
    %cst_12 = arith.constant 6.250000e-02 : f32
    %21 = vector.broadcast %cst_12 : f32 to vector<1x512xf32>
    %22 = arith.mulf %20, %21 : vector<1x512xf32>
    %cst_13 = arith.constant 9.99999974E-6 : f32
    %23 = vector.broadcast %cst_13 : f32 to vector<1x512xf32>
    %24 = arith.addf %22, %23 : vector<1x512xf32>
    %25 = math.rsqrt %24 : vector<1x512xf32>
    %26 = arith.mulf %4, %25 : vector<1x512xf32>
    %27 = arith.mulf %15, %26 : vector<1x512xf32>
    %28 = arith.subf %5, %27 : vector<1x512xf32>
    %29 = vector.broadcast %26 : vector<1x512xf32> to vector<16x512xf32>
    %30 = arith.mulf %11, %29 : vector<16x512xf32>
    %31 = vector.broadcast %28 : vector<1x512xf32> to vector<16x512xf32>
    %32 = arith.addf %30, %31 : vector<16x512xf32>
    %33 = arith.truncf %32 : vector<16x512xf32> to vector<16x512xbf16>
    %c3 = arith.constant 3 : index
    %c0_14 = arith.constant 0 : index
    %34 = vector.load %arg6[%c3, %c0_14] : memref<10x512xf32, #tpu.memory_space<vmem>>, vector<1x512xf32>
    %c4 = arith.constant 4 : index
    %c0_15 = arith.constant 0 : index
    %35 = vector.load %arg6[%c4, %c0_15] : memref<10x512xf32, #tpu.memory_space<vmem>>, vector<1x512xf32>
    %c5 = arith.constant 5 : index
    %c0_16 = arith.constant 0 : index
    %36 = vector.load %arg6[%c5, %c0_16] : memref<10x512xf32, #tpu.memory_space<vmem>>, vector<1x512xf32>
    %c0_17 = arith.constant 0 : index
    %c0_18 = arith.constant 0 : index
    %37 = vector.load %arg3[%c0_17, %c0_18] : memref<512x512xbf16, #tpu.memory_space<vmem>>, vector<512x512xbf16>
    %cst_19 = arith.constant dense<0.000000e+00> : vector<16x512xf32>
    %38 = tpu.matmul %33, %37, %cst_19 {dimension_numbers = #tpu.dot_dimension_numbers<[1], [0], [0], [1], [0, 0, 1, 1], [], []>} : vector<16x512xbf16>, vector<512x512xbf16>, vector<16x512xf32> -> vector<16x512xf32>
    %39 = vector.broadcast %34 : vector<1x512xf32> to vector<16x512xf32>
    %40 = arith.addf %38, %39 : vector<16x512xf32>
    %cst_20 = arith.constant 0.000000e+00 : f32
    %41 = vector.broadcast %cst_20 : f32 to vector<16x512xf32>
    %42 = arith.maximumf %40, %41 : vector<16x512xf32>
    %cst_21 = arith.constant dense<0.000000e+00> : vector<512xf32>
    %43 = vector.multi_reduction <add>, %42, %cst_21 [0] : vector<16x512xf32> to vector<512xf32>
    %44 = vector.shape_cast %43 : vector<512xf32> to vector<1x512xf32>
    %cst_22 = arith.constant 6.250000e-02 : f32
    %45 = vector.broadcast %cst_22 : f32 to vector<1x512xf32>
    %46 = arith.mulf %44, %45 : vector<1x512xf32>
    %47 = vector.broadcast %46 : vector<1x512xf32> to vector<16x512xf32>
    %48 = arith.subf %42, %47 : vector<16x512xf32>
    %49 = arith.mulf %48, %48 : vector<16x512xf32>
    %cst_23 = arith.constant dense<0.000000e+00> : vector<512xf32>
    %50 = vector.multi_reduction <add>, %49, %cst_23 [0] : vector<16x512xf32> to vector<512xf32>
    %51 = vector.shape_cast %50 : vector<512xf32> to vector<1x512xf32>
    %cst_24 = arith.constant 6.250000e-02 : f32
    %52 = vector.broadcast %cst_24 : f32 to vector<1x512xf32>
    %53 = arith.mulf %51, %52 : vector<1x512xf32>
    %cst_25 = arith.constant 9.99999974E-6 : f32
    %54 = vector.broadcast %cst_25 : f32 to vector<1x512xf32>
    %55 = arith.addf %53, %54 : vector<1x512xf32>
    %56 = math.rsqrt %55 : vector<1x512xf32>
    %57 = arith.mulf %35, %56 : vector<1x512xf32>
    %58 = arith.mulf %46, %57 : vector<1x512xf32>
    %59 = arith.subf %36, %58 : vector<1x512xf32>
    %60 = vector.broadcast %57 : vector<1x512xf32> to vector<16x512xf32>
    %61 = arith.mulf %42, %60 : vector<16x512xf32>
    %62 = vector.broadcast %59 : vector<1x512xf32> to vector<16x512xf32>
    %63 = arith.addf %61, %62 : vector<16x512xf32>
    %64 = arith.truncf %63 : vector<16x512xf32> to vector<16x512xbf16>
    %c6 = arith.constant 6 : index
    %c0_26 = arith.constant 0 : index
    %65 = vector.load %arg6[%c6, %c0_26] : memref<10x512xf32, #tpu.memory_space<vmem>>, vector<1x512xf32>
    %c7 = arith.constant 7 : index
    %c0_27 = arith.constant 0 : index
    %66 = vector.load %arg6[%c7, %c0_27] : memref<10x512xf32, #tpu.memory_space<vmem>>, vector<1x512xf32>
    %c8 = arith.constant 8 : index
    %c0_28 = arith.constant 0 : index
    %67 = vector.load %arg6[%c8, %c0_28] : memref<10x512xf32, #tpu.memory_space<vmem>>, vector<1x512xf32>
    %c0_29 = arith.constant 0 : index
    %c0_30 = arith.constant 0 : index
    %68 = vector.load %arg4[%c0_29, %c0_30] : memref<512x512xbf16, #tpu.memory_space<vmem>>, vector<512x512xbf16>
    %cst_31 = arith.constant dense<0.000000e+00> : vector<16x512xf32>
    %69 = tpu.matmul %64, %68, %cst_31 {dimension_numbers = #tpu.dot_dimension_numbers<[1], [0], [0], [1], [0, 0, 1, 1], [], []>} : vector<16x512xbf16>, vector<512x512xbf16>, vector<16x512xf32> -> vector<16x512xf32>
    %70 = vector.broadcast %65 : vector<1x512xf32> to vector<16x512xf32>
    %71 = arith.addf %69, %70 : vector<16x512xf32>
    %cst_32 = arith.constant 0.000000e+00 : f32
    %72 = vector.broadcast %cst_32 : f32 to vector<16x512xf32>
    %73 = arith.maximumf %71, %72 : vector<16x512xf32>
    %cst_33 = arith.constant dense<0.000000e+00> : vector<512xf32>
    %74 = vector.multi_reduction <add>, %73, %cst_33 [0] : vector<16x512xf32> to vector<512xf32>
    %75 = vector.shape_cast %74 : vector<512xf32> to vector<1x512xf32>
    %cst_34 = arith.constant 6.250000e-02 : f32
    %76 = vector.broadcast %cst_34 : f32 to vector<1x512xf32>
    %77 = arith.mulf %75, %76 : vector<1x512xf32>
    %78 = vector.broadcast %77 : vector<1x512xf32> to vector<16x512xf32>
    %79 = arith.subf %73, %78 : vector<16x512xf32>
    %80 = arith.mulf %79, %79 : vector<16x512xf32>
    %cst_35 = arith.constant dense<0.000000e+00> : vector<512xf32>
    %81 = vector.multi_reduction <add>, %80, %cst_35 [0] : vector<16x512xf32> to vector<512xf32>
    %82 = vector.shape_cast %81 : vector<512xf32> to vector<1x512xf32>
    %cst_36 = arith.constant 6.250000e-02 : f32
    %83 = vector.broadcast %cst_36 : f32 to vector<1x512xf32>
    %84 = arith.mulf %82, %83 : vector<1x512xf32>
    %cst_37 = arith.constant 9.99999974E-6 : f32
    %85 = vector.broadcast %cst_37 : f32 to vector<1x512xf32>
    %86 = arith.addf %84, %85 : vector<1x512xf32>
    %87 = math.rsqrt %86 : vector<1x512xf32>
    %88 = arith.mulf %66, %87 : vector<1x512xf32>
    %89 = arith.mulf %77, %88 : vector<1x512xf32>
    %90 = arith.subf %67, %89 : vector<1x512xf32>
    %91 = vector.broadcast %88 : vector<1x512xf32> to vector<16x512xf32>
    %92 = arith.mulf %73, %91 : vector<16x512xf32>
    %93 = vector.broadcast %90 : vector<1x512xf32> to vector<16x512xf32>
    %94 = arith.addf %92, %93 : vector<16x512xf32>
    %95 = arith.truncf %94 : vector<16x512xf32> to vector<16x512xbf16>
    %c0_38 = arith.constant 0 : index
    %c0_39 = arith.constant 0 : index
    %96 = vector.load %arg5[%c0_38, %c0_39] : memref<512x128xbf16, #tpu.memory_space<vmem>>, vector<512x128xbf16>
    %cst_40 = arith.constant dense<0.000000e+00> : vector<16x128xf32>
    %97 = tpu.matmul %95, %96, %cst_40 {dimension_numbers = #tpu.dot_dimension_numbers<[1], [0], [0], [1], [0, 0, 1, 1], [], []>} : vector<16x512xbf16>, vector<512x128xbf16>, vector<16x128xf32> -> vector<16x128xf32>
    %c9 = arith.constant 9 : index
    %c0_41 = arith.constant 0 : index
    %98 = vector.load %arg6[%c9, %c0_41] : memref<10x512xf32, #tpu.memory_space<vmem>>, vector<1x128xf32>
    %99 = vector.broadcast %98 : vector<1x128xf32> to vector<16x128xf32>
    %100 = arith.addf %97, %99 : vector<16x128xf32>
    %c0_42 = arith.constant 0 : index
    %c0_43 = arith.constant 0 : index
    %c0_44 = arith.constant 0 : index
    %101 = vector.load %arg7[%c0_42, %c0_43, %c0_44] : memref<1x16x128xf32, #tpu.memory_space<vmem>>, vector<1x16x128xf32>
    %102 = vector.shape_cast %101 : vector<1x16x128xf32> to vector<16x128xf32>
    %103 = vector.shape_cast %100 : vector<16x128xf32> to vector<1x16x128xf32>
    tpu.vector_store %arg7[%c0_42, %c0_43, %c0_44], %103 {strides = array<i32>} : memref<1x16x128xf32, #tpu.memory_space<vmem>>, vector<1x16x128xf32>,
    return
  }
  func.func @transform_0(%arg0: i32) -> (i32, i32, i32) {
    %c0_i32 = arith.constant 0 : i32
    %c0_i32_0 = arith.constant 0 : i32
    %c0_i32_1 = arith.constant 0 : i32
    return %arg0, %c0_i32, %c0_i32_0 : i32, i32, i32
  }
  func.func @transform_1(%arg0: i32) -> (i32, i32) {
    %c0_i32 = arith.constant 0 : i32
    %c0_i32_0 = arith.constant 0 : i32
    %c0_i32_1 = arith.constant 0 : i32
    return %c0_i32, %c0_i32_0 : i32, i32
  }
  func.func @transform_2(%arg0: i32) -> (i32, i32) {
    %c0_i32 = arith.constant 0 : i32
    %c0_i32_0 = arith.constant 0 : i32
    %c0_i32_1 = arith.constant 0 : i32
    return %c0_i32, %c0_i32_0 : i32, i32
  }
  func.func @transform_3(%arg0: i32) -> (i32, i32) {
    %c0_i32 = arith.constant 0 : i32
    %c0_i32_0 = arith.constant 0 : i32
    %c0_i32_1 = arith.constant 0 : i32
    return %c0_i32, %c0_i32_0 : i32, i32
  }
  func.func @transform_4(%arg0: i32) -> (i32, i32) {
    %c0_i32 = arith.constant 0 : i32
    %c0_i32_0 = arith.constant 0 : i32
    %c0_i32_1 = arith.constant 0 : i32
    return %c0_i32, %c0_i32_0 : i32, i32
  }
  func.func @transform_5(%arg0: i32) -> (i32, i32) {
    %c0_i32 = arith.constant 0 : i32
    %c0_i32_0 = arith.constant 0 : i32
    %c0_i32_1 = arith.constant 0 : i32
    return %c0_i32, %c0_i32_0 : i32, i32
  }
  func.func @transform_6(%arg0: i32) -> (i32, i32, i32) {
    %c0_i32 = arith.constant 0 : i32
    %c0_i32_0 = arith.constant 0 : i32
    %c0_i32_1 = arith.constant 0 : i32
    return %arg0, %c0_i32, %c0_i32_0 : i32, i32, i32
  }
}

</mosaic_0001>

<bundles_post_ra>
// kernel: tpu_custom_call.1
= control target key start
LH: loop header
LB: loop body
LE: loop exit
PB: predicated region body
PF: predicated region fallthrough
CT: control target
= control target key end

     0   :  { %11 = vsyncpa [#allocation3], 0  ;;  %s5939_s0 = inlined_call_operand.hbm [shape: f32[2,16,273], index: 0, kind: input, shape index: {}]   ;;  %s5940_s1 = inlined_call_operand.hbm [shape: bf16[273,512], index: 1, kind: input, shape index: {}]   ;;  %s5941_s2 = inlined_call_operand.hbm [shape: bf16[512,512], index: 2, kind: input, shape index: {}]   ;;  %s5942_s3 = inlined_call_operand.hbm [shape: bf16[512,512], index: 3, kind: input, shape index: {}]   ;;  %s5943_s4 = inlined_call_operand.hbm [shape: bf16[512,128], index: 4, kind: input, shape index: {}]   ;;  %s5944_s5 = inlined_call_operand.hbm [shape: f32[10,512], index: 5, kind: input, shape index: {}]   ;;  %s5945_s6 = inlined_call_operand.hbm [shape: f32[2,16,128], index: 6, kind: output, shape index: {}]  }
   0x1   :  { %13 = vsyncpa [#allocation3 + $0x1], 0 }
   0x2   :  { %14 = vsyncpa [#allocation6], 0 }
   0x3   :  { %15 = vsyncpa [#allocation9], 0 }
   0x4   :  { %16 = vsyncpa [#allocation12], 0 }
   0x5   :  { %17 = vsyncpa [#allocation4], 0 }
   0x6   :  { %19 = vsyncpa [#allocation4 + $0x1], 0  ;;  %s5442_s21 = smov 0   ;;  %s5444_s22 = smov 0  }
   0x7   :  { %s5446_s23 = smov 0   ;;  %s5448_s24 = smov 0  }
   0x8 LB: > { %s5388_s25 = smov [#allocation5]   ;;  %s5463_s27 = sadd.s32 4294967295, %s5386_s24   ;;  %s5386_s24 = sphi %s5448_s24, %s5971_s24   ;;  %s5382_s23 = sphi %s5446_s23, %s5970_s23   ;;  %s5378_s22 = sphi %s5444_s22, %s5969_s22   ;;  %s5374_s21 = sphi %s5442_s21, %s5968_s21  }
   0x9   : > { %s199_s26 = sshll.u32 %s5388_s25, 4  ;;  %p4067_p0 = scmp.ge.s32.totalorder %s5386_s24, 1  ;;  %s200_s26 = int_to_ptr.vmem [resolvable:$true] %s199_s26 }
   0xa   : > { %p5946_p1 = scmp.eq.s32.totalorder %s5463_s27, 0  ;;  %p187_p2 = scmp.lt.s32.totalorder %s5386_s24, 3 }
   0xb   : > { %s5389_s29 = smov [#allocation8]   ;;  %s5390_s8 = smov [#allocation7]  }
   0xc   : > { %p5468_p3 = pnand %p4067_p0, %p187_p2  ;;  %s225_s30 = sshll.u32 %s5389_s29, 4  ;;  %s5481_s30 = int_to_ptr.vmem [resolvable:$true] %s225_s30 }
   0xd   : > { %s212_s9 = sshll.u32 %s5390_s8, 4  ;;  %s5163_s11 = scalar_lea.vmem %s200_s26, 8960  ;;  %s5483_s9 = int_to_ptr.vmem [resolvable:$true] %s212_s9 }
   0xe   : > { %s5950_s28 = scalar_select %p5468_p3, 1, 0 }
   0xf   : > { %p4521_p5 = pneg %p5468_p3  ;;  %p5164_p8 = scmp.ne.s32.totalorder %s200_s26, %s5163_s11 }
  0x10   : > { %p5171_p11 = scmp.lt.s32.totalorder %s200_s26, %s200_s26  ;;  %p5172_p12 = scmp.lt.s32.totalorder %s5163_s11, %s5163_s11 }
  0x11   : > { %p5477_p6 = pnand %p4521_p5, %p5946_p1 }
  0x12   : > { %p5173_p13 = por %p5172_p12, %p5171_p11 }
  0x13   : > { %p5487_p7 = pneg %p5477_p6 }
  0x15   : > { %p5166_p9 = pnand %p5164_p8, %p5487_p7 }
  0x17   : > { %p5167_p10 = pneg %p5166_p9 }
  0x19   : > { %p5174_p0 = pnand %p5173_p13, %p5167_p10 }
  0x1b   : > { %5177 = shalt.err (!%p5174_p0)
}
  0x1c   : > { %s5391_s12 = smov 256   ;;  %s5392_s13 = smov 16  }
  0x1d   : > { %4524 = dma.hbm_to_vmem [thread:$0]  (!%p5477_p6), %s5940_s1, 8960, %s200_s26, [#allocation6], %s5391_s12, %s5391_s12, %s5392_s13  }
  0x1e   : > { %s5189_s16 = scalar_lea.vmem %s5481_s30, 16384  ;;  %p5197_p9 = scmp.lt.s32.totalorder %s5481_s30, %s5481_s30 }
  0x1f   : > { %p5190_p2 = scmp.ne.s32.totalorder %s5481_s30, %s5189_s16  ;;  %p5198_p10 = scmp.lt.s32.totalorder %s5189_s16, %s5189_s16 }
  0x21   : > { %p5192_p5 = pnand %p5190_p2, %p5487_p7  ;;  %p5199_p11 = por %p5198_p10, %p5197_p9 }
  0x23   : > { %p5193_p8 = pneg %p5192_p5 }
  0x25   : > { %p5200_p12 = pnand %p5199_p11, %p5193_p8 }
  0x27   : > { %5203 = shalt.err (!%p5200_p12)
}
  0x28   : > { %4530 = dma.hbm_to_vmem [thread:$0]  (!%p5477_p6), %s5942_s3, 16384, %s5481_s30, [#allocation9], %s5391_s12, %s5391_s12, %s5392_s13  }
  0x29   : > { %s5215_s19 = scalar_lea.vmem %s5483_s9, 16384  ;;  %p5223_p5 = scmp.lt.s32.totalorder %s5483_s9, %s5483_s9 }
  0x2a   : > { %p5216_p13 = scmp.ne.s32.totalorder %s5483_s9, %s5215_s19  ;;  %p5224_p8 = scmp.lt.s32.totalorder %s5215_s19, %s5215_s19 }
  0x2c   : > { %p5218_p0 = pnand %p5216_p13, %p5487_p7  ;;  %p5225_p9 = por %p5224_p8, %p5223_p5 }
  0x2e   : > { %p5219_p2 = pneg %p5218_p0 }
  0x30   : > { %p5226_p10 = pnand %p5225_p9, %p5219_p2 }
  0x32   : > { %5229 = shalt.err (!%p5226_p10)
}
  0x33   : > { %4527 = dma.hbm_to_vmem [thread:$0]  (!%p5477_p6), %s5941_s2, 16384, %s5483_s9, [#allocation6], %s5391_s12, %s5391_s12, %s5392_s13  }
  0x34   : > { %s5393_s26 = smov [#allocation10]  }
  0x35   : > { %s238_s29 = sshll.u32 %s5393_s26, 4  ;;  %s239_s29 = int_to_ptr.vmem [resolvable:$true] %s238_s29 }
  0x36   : > { %s5241_s30 = scalar_lea.vmem %s239_s29, 4096  ;;  %p5249_p0 = scmp.lt.s32.totalorder %s239_s29, %s239_s29 }
  0x37   : > { %p5242_p11 = scmp.ne.s32.totalorder %s239_s29, %s5241_s30  ;;  %p5250_p5 = scmp.lt.s32.totalorder %s5241_s30, %s5241_s30 }
  0x39   : > { %p5244_p12 = pnand %p5242_p11, %p5487_p7  ;;  %p5251_p2 = por %p5250_p5, %p5249_p0 }
  0x3b   : > { %p5245_p13 = pneg %p5244_p12 }
  0x3d   : > { %p5252_p8 = pnand %p5251_p2, %p5245_p13 }
  0x3f   : > { %5255 = shalt.err (!%p5252_p8)
}
  0x40   : > { %s5394_s8 = smov 64   ;;  %s5395_s11 = smov 4  }
  0x41   : > { %4533 = dma.hbm_to_vmem [thread:$0]  (!%p5477_p6), %s5943_s4, 4096, %s239_s29, [#allocation9], %s5394_s8, %s5394_s8, %s5395_s11  }
  0x42   : > { %s5396_s12 = smov [#allocation11]  }
  0x43   : > { %s251_s13 = sshll.u32 %s5396_s12, 4  ;;  %s252_s13 = int_to_ptr.vmem [resolvable:$true] %s251_s13 }
  0x44   : > { %s5267_s15 = scalar_lea.vmem %s252_s13, 1024  ;;  %p5275_p12 = scmp.lt.s32.totalorder %s252_s13, %s252_s13 }
  0x45   : > { %p5268_p9 = scmp.ne.s32.totalorder %s252_s13, %s5267_s15  ;;  %p5276_p13 = scmp.lt.s32.totalorder %s5267_s15, %s5267_s15 }
  0x47   : > { %p5270_p10 = pnand %p5268_p9, %p5487_p7  ;;  %p5277_p0 = por %p5276_p13, %p5275_p12 }
  0x49   : > { %p5271_p11 = pneg %p5270_p10 }
  0x4b   : > { %p5278_p5 = pnand %p5277_p0, %p5271_p11 }
  0x4d   : > { %5281 = shalt.err (!%p5278_p5)
}
  0x4e   : > { %s5397_s16 = smov 512   ;;  %s5398_s10 = smov 32  }
  0x4f   : > { %4536 = dma.hbm_to_vmem [thread:$0]  (!%p5477_p6), %s5944_s5, 1024, %s252_s13, [#allocation12], %s5397_s16, %s5397_s16, %s5398_s10  }
  0x50   : > { %s4066_s19 = sadd.s32 4294967294, %s5386_s24   ;;  %s5538_s20 = sadd.s32 1, %s5386_s24  }
  0x51   : > { %s32_s25 = sadd.s32 1, %s5382_s23  ;;  %s29_s26 = ssub.s32 %s5386_s24, %s5538_s20 }
  0x52   : > { %p39_p7 = scmp.ne.s32.totalorder %s5382_s23, %s5378_s22  ;;  %p30_p2 = scmp.eq.s32.totalorder %s29_s26, 0 }
  0x53   : > { %p40_p8 = scmp.eq.s32.totalorder %s5386_s24, 0  ;;  %p45_p9 = scmp.ne.s32.totalorder %s5378_s22, %s5374_s21 }
  0x54   : > { %p174_p10 = scmp.eq.s32.totalorder %s5463_s27, 1  ;;  %p180_p13 = scmp.eq.s32.totalorder %s4066_s19, 1 }
  0x55   : > { %s5550_s29 = scalar_select %p30_p2, %s5382_s23, %s32_s25  }
  0x56   : > { %p41_p11 = por %p40_p8, %p39_p7  ;;  %p5554_p12 = por %p5946_p1, %p45_p9 }
  0x57   : > { %p5558_p6 = por %p174_p10, %p39_p7  ;;  %p4550_p0 = scmp.lt.s32.totalorder %s5386_s24, 2 }
  0x58   : > { %s5953_s7 = scalar_select %p5554_p12, 1, 0 }
  0x59   : > { %s5954_s30 = scalar_select %p5558_p6, 1, 0 }
  0x5a   : > { %s265_s8 = sand.u32 1, %s5382_s23   ;;  %p5564_p5 = por %p180_p13, %p45_p9 }
  0x5b   : > { %s4494_s14 = smul.u32 48, %s265_s8  ;;  %p5568_p2 = pnand %p4550_p0, %p41_p11 }
  0x5c   : > { %s5955_s11 = scalar_select %p5564_p5, 1, 0 }
  0x5d   : > { %s4495_s12 = smul.u32 768, %s5386_s24  ;;  %s269_s10 = scalar_lea.vmem [#allocation2], %s4494_s14 }
  0x5e   : > { %s276_s17 = sshll.u32 %s269_s10, 4  ;;  %s5580_s18 = scalar_lea.sflag [#allocation3], %s265_s8  ;;  %s5578_s17 = int_to_ptr.vmem [resolvable:$true] %s276_s17 }
  0x5f   : > { %s5576_s16 = scalar_lea.hbm %s5939_s0, %s4495_s12  ;;  %p5284_p8 = pneg %p5568_p2 }
  0x60   : > { %s5282_s19 = scalar_lea.hbm %s5576_s16, 768  ;;  %s5287_s12 = scalar_lea.hbm %s5939_s0, 1536 }
  0x61   : > { %p5283_p7 = scmp.ne.s32.totalorder %s5576_s16, %s5282_s19  ;;  %p5288_p11 = scmp.lt.s32.totalorder %s5576_s16, %s5939_s0 }
  0x62   : > { %p5289_p13 = scmp.lt.s32.totalorder %s5287_s12, %s5282_s19 }
  0x63   : > { %p5285_p9 = pnand %p5284_p8, %p5283_p7 }
  0x64   : > { %p5290_p0 = por %p5289_p13, %p5288_p11 }
  0x65   : > { %p5286_p10 = pneg %p5285_p9 }
  0x67   : > { %p5291_p4 = pnand %p5290_p0, %p5286_p10 }
  0x69   : > { %5294 = shalt.err (!%p5291_p4)
}
  0x6a   : > { %s5295_s8 = scalar_lea.vmem %s5578_s17, 768  ;;  %s5399_s14 = smov [#allocation2]  }
  0x6b   : > { %p5296_p1 = scmp.ne.s32.totalorder %s5578_s17, %s5295_s8  ;;  %s5300_s10 = sshll.u32 %s5399_s14, 4  ;;  %s5301_s10 = int_to_ptr.vmem [resolvable:$false] %s5300_s10 }
  0x6c   : > { %s5302_s25 = scalar_lea.vmem %s5301_s10, 1536  ;;  %p5303_p9 = scmp.lt.s32.totalorder %s5578_s17, %s5301_s10 }
  0x6d   : > { %p5298_p5 = pnand %p5296_p1, %p5284_p8  ;;  %p5304_p6 = scmp.lt.s32.totalorder %s5302_s25, %s5295_s8 }
  0x6f   : > { %p5299_p7 = pneg %p5298_p5  ;;  %p5305_p12 = por %p5304_p6, %p5303_p9 }
  0x71   : > { %p5306_p3 = pnand %p5305_p12, %p5299_p7 }
  0x73   : > { %5309 = shalt.err (!%p5306_p3)
}
  0x74   : > { %s5400_s19 = smov 384   ;;  %s5401_s26 = smov 24  }
  0x75   : > { %4540 = dma.hbm_to_vmem [thread:$0]  (!%p5568_p2), %s5576_s16, 768, %s5578_s17, %s5580_s18, %s5400_s19, %s5400_s19, %s5401_s26  }
  0x76   : > { %p5957_p1 = scmp.ne.s32.totalorder %s5950_s28, 0 }
  0x77   : > { %s5604_s12 = sand.u32 (!%p5957_p1), 1, %s5378_s22   ;;  %p5958_p3 = scmp.ne.s32.totalorder (!%p5957_p1), %s5953_s7, 0 }
  0x78   : > { %288 = sbr.rel (%p5957_p1) target bundleno = 1424 (0x590), region = 44  ;;  %s291_s15 = scalar_lea.sflag (!%p5957_p1), [#allocation3], %s5604_s12 }
  0x79   : > { %s4496_s13 = smul.u32 (!%p5957_p1), 48, %s5604_s12 }
  0x7b   : > { %s5608_s8 = scalar_lea.vmem (!%p5957_p1), [#allocation2], %s4496_s13 }
  0x7d   : > { %5353 = dma.done.wait (%p5958_p3), %s291_s15, 768  }
  0x7e   : > { %5355 = vsyncadd (%p5958_p3), %s291_s15, 4294966528  ;;  %p5959_p4 = scmp.eq.s32.totalorder %s5463_s27, 0 }
  0x80   : > { %5357 = dma.done.wait (%p5959_p4), [#allocation6], 25344   ;;  %p5960_p12 = pmov %p5959_p4 }
  0x81   : > { %p5961_p6 = pmov %p5959_p4 }
  0x82   : > { %5359 = vsyncadd (%p5960_p12), [#allocation6], 4294941952 }
  0x83   : > { %5361 = dma.done.wait (%p5961_p6), [#allocation9], 20480   ;;  %p5962_p5 = pmov %p5959_p4 }
  0x84   : > { %p5963_p2 = pmov %p5959_p4 }
  0x85   : > { %5363 = vsyncadd (%p5962_p5), [#allocation9], 4294946816 }
  0x86   : > { %5365 = dma.done.wait (%p5963_p2), [#allocation12], 1024   ;;  %p5964_p8 = pmov %p5963_p2 }
  0x87   : > { %v5402_v0 = vmov 0   ;;  %vm803_vm0 = vcmask 1040384   ;;  %v4606_v1 = vld [vmem:[#allocation5 + $0xe4] ss:$16 sps:$4 sm:$0xff]   ;;  %v4608_v2 = vld [vmem:[#allocation5 + $0xe0] ss:$16 sps:$4 sm:$0xff]  }
  0x88   : > { %5367 = vsyncadd (%p5964_p8), [#allocation12], 4294966272  ;;  %893 = vmatprep.mubr.bf16.mxu1 %v5402_v0  ;;  %v426_v3 = vld [vmem:[#allocation5 + $0x220] sm:$0x11]  ;;  %v5628_v4 = vsel %vm803_vm0, 65535, %v5402_v0  ;;  %818 = vmatprep.subr.bf16.mxu0 %v4606_v1  ;;  %v349_v16 = vld [vmem:[%s5608_s8 + $0x28] sm:$0xff] }
  0x89   : > { %v4151_v5 = vcombine.high %v426_v3, %v426_v3  ;;  %v4150_v6 = vcombine.low %v426_v3, %v426_v3  ;;  %v4611_v7 = vld [vmem:[#allocation5 + $0xc4] ss:$16 sps:$4 sm:$0xff]   ;;  %819 = vmatpush1.bf16.msra.mxu0 %v4608_v2  ;;  %v4613_v8 = vld [vmem:[#allocation5 + $0xc0] ss:$16 sps:$4 sm:$0xff]   ;;  %v4622_v17 = vld [vmem:[#allocation5 + $0xec] ss:$16 sps:$4 sm:$0xff]  }
  0x8a   : > { %820 = vmatprep.subr.bf16.mxu0 %v4611_v7  ;;  %v4614_v11 = vld [vmem:[#allocation5 + $0x204] ss:$16 sps:$4 sm:$0xff]   ;;  %v4616_v12 = vld [vmem:[#allocation5 + $0x200] ss:$16 sps:$4 sm:$0xff]   ;;  %vm799_vm1 = vcmask 138240   ;;  %v345_v52 = vld [vmem:[%s5608_s8 + $0x8] sm:$0xff] }
  0x8b   : > { %v810_v9 = vand.u32 %v4151_v5, %v5628_v4  ;;  %v807_v10 = vand.u32 %v4150_v6, %v5628_v4  ;;  %v4617_v13 = vld [vmem:[#allocation5 + $0xa4] ss:$16 sps:$4 sm:$0xff]   ;;  %v4619_v14 = vld [vmem:[#allocation5 + $0xa0] ss:$16 sps:$4 sm:$0xff]   ;;  %v4620_v20 = vld [vmem:[#allocation5 + $0xe8] ss:$16 sps:$4 sm:$0xff]  }
  0x8c   : > { %v346_v15 = vld [vmem:[%s5608_s8 + $0x10] sm:$0xff]  ;;  %v4628_v22 = vld [vmem:[#allocation5 + $0xcc] ss:$16 sps:$4 sm:$0xff]   ;;  %v4626_v24 = vld [vmem:[#allocation5 + $0xc8] ss:$16 sps:$4 sm:$0xff]   ;;  %s4081_s28 = sshll.u32 %s5604_s12, 4 }
  0x8d   : > { %873 = vmatprep.subr.bf16.mxu1 %v810_v9  ;;  %821 = vmatpush1.bf16.msra.mxu0 %v4613_v8  ;;  %v4623_v18 = vld [vmem:[#allocation5 + $0x84] ss:$16 sps:$4 sm:$0xff]   ;;  %v5634_v19 = vpack.c.bf16 %v349_v16, %v346_v15  ;;  %v4625_v21 = vld [vmem:[#allocation5 + $0x80] ss:$16 sps:$4 sm:$0xff]   ;;  %v4634_v26 = vld [vmem:[#allocation5 + $0xac] ss:$16 sps:$4 sm:$0xff]  }
  0x8e   : > { %874 = vmatpush1.bf16.msra.mxu1 %v807_v10  ;;  %822 = vmatprep.subr.bf16.mxu0 %v4617_v13  ;;  %v4629_v23 = vld [vmem:[#allocation5 + $0x64] ss:$16 sps:$4 sm:$0xff]   ;;  %v4631_v25 = vld [vmem:[#allocation5 + $0x60] ss:$16 sps:$4 sm:$0xff]   ;;  %v4632_v28 = vld [vmem:[#allocation5 + $0xa8] ss:$16 sps:$4 sm:$0xff]  }
  0x8f   : > { %875 = vmatprep.subr.bf16.mxu1 %v4614_v11  ;;  %v4635_v27 = vld [vmem:[#allocation5 + $0x44] ss:$16 sps:$4 sm:$0xff]   ;;  %v4637_v29 = vld [vmem:[#allocation5 + $0x40] ss:$16 sps:$4 sm:$0xff]   ;;  %v4640_v30 = vld [vmem:[#allocation5 + $0x8c] ss:$16 sps:$4 sm:$0xff]  }
  0x90   : > { %v4641_v31 = vld [vmem:[#allocation5 + $0x24] ss:$16 sps:$4 sm:$0xff]   ;;  %v4638_v32 = vld [vmem:[#allocation5 + $0x88] ss:$16 sps:$4 sm:$0xff]   ;;  %v4643_v33 = vld [vmem:[#allocation5 + $0x20] ss:$16 sps:$4 sm:$0xff]  }
  0x91   : > { %823 = vmatpush1.bf16.msra.mxu0 %v4619_v14  ;;  %v4646_v34 = vld [vmem:[#allocation5 + $0x6c] ss:$16 sps:$4 sm:$0xff]   ;;  %v4647_v35 = vld [vmem:[#allocation5 + $0x4] ss:$16 sps:$4 sm:$0xff]   ;;  %v4644_v36 = vld [vmem:[#allocation5 + $0x68] ss:$16 sps:$4 sm:$0xff]  }
  0x92   : > { %876 = vmatpush1.bf16.msra.mxu1 %v4616_v12  ;;  %824 = vmatprep.subr.bf16.mxu0 %v4623_v18  ;;  %v4649_v37 = vld [vmem:[#allocation5] ss:$16 sps:$4 sm:$0xff]   ;;  %v4652_v38 = vld [vmem:[#allocation5 + $0x4c] ss:$16 sps:$4 sm:$0xff]   ;;  %v4653_v39 = vld [vmem:[#allocation5 + $0x1e4] ss:$16 sps:$4 sm:$0xff]  }
  0x93   : > { %904 = vmatprep.subr.bf16.mxu1 %v4622_v17  ;;  %v4650_v40 = vld [vmem:[#allocation5 + $0x48] ss:$16 sps:$4 sm:$0xff]   ;;  %v4655_v41 = vld [vmem:[#allocation5 + $0x1e0] ss:$16 sps:$4 sm:$0xff]   ;;  %v4658_v42 = vld [vmem:[#allocation5 + $0x2c] ss:$16 sps:$4 sm:$0xff]  }
  0x94   : > { %v4659_v43 = vld [vmem:[#allocation5 + $0x1c4] ss:$16 sps:$4 sm:$0xff]   ;;  %v4656_v44 = vld [vmem:[#allocation5 + $0x28] ss:$16 sps:$4 sm:$0xff]   ;;  %v4661_v45 = vld [vmem:[#allocation5 + $0x1c0] ss:$16 sps:$4 sm:$0xff]  }
  0x95   : > { %4154 = vmatmul.mubr.msk.bf16.vlgmr.msra.gmra.mxu1 %vm799_vm1, %v5634_v19  ;;  %825 = vmatpush1.bf16.msra.mxu0 %v4625_v21  ;;  %v4664_v46 = vld [vmem:[#allocation5 + $0xc] ss:$16 sps:$4 sm:$0xff]   ;;  %v4665_v47 = vld [vmem:[#allocation5 + $0x1a4] ss:$16 sps:$4 sm:$0xff]   ;;  %v4662_v48 = vld [vmem:[#allocation5 + $0x8] ss:$16 sps:$4 sm:$0xff]  }
  0x96   : > { %905 = vmatpush1.bf16.msra.mxu1 %v4620_v20  ;;  %826 = vmatprep.subr.bf16.mxu0 %v4629_v23  ;;  %v4667_v49 = vld [vmem:[#allocation5 + $0x1a0] ss:$16 sps:$4 sm:$0xff]   ;;  %v4670_v50 = vld [vmem:[#allocation5 + $0x1ec] ss:$16 sps:$4 sm:$0xff]   ;;  %v4671_v51 = vld [vmem:[#allocation5 + $0x184] ss:$16 sps:$4 sm:$0xff]  }
  0x97   : > { %906 = vmatprep.subr.bf16.mxu1 %v4628_v22  ;;  %v348_v53 = vld [vmem:[%s5608_s8 + $0x20] sm:$0xff]  ;;  %v4668_v54 = vld [vmem:[#allocation5 + $0x1e8] ss:$16 sps:$4 sm:$0xff]   ;;  %v4676_v56 = vld [vmem:[#allocation5 + $0x1cc] ss:$16 sps:$4 sm:$0xff]   ;;  %s342_s7 = scalar_lea.vmem [#allocation13], %s4081_s28 }
  0x98   : > { %v4673_v55 = vld [vmem:[#allocation5 + $0x180] ss:$16 sps:$4 sm:$0xff]   ;;  %v351_v57 = vpack.c.bf16 %v348_v53, %v345_v52  ;;  %v4677_v58 = vld [vmem:[#allocation5 + $0x164] ss:$16 sps:$4 sm:$0xff]   ;;  %v4674_v59 = vld [vmem:[#allocation5 + $0x1c8] ss:$16 sps:$4 sm:$0xff]  }
  0x99   : > { %827 = vmatpush1.bf16.msra.mxu0 %v4631_v25  ;;  %v4679_v60 = vld [vmem:[#allocation5 + $0x160] ss:$16 sps:$4 sm:$0xff]   ;;  %v4682_v61 = vld [vmem:[#allocation5 + $0x1ac] ss:$16 sps:$4 sm:$0xff]   ;;  %v4683_v62 = vld [vmem:[#allocation5 + $0x144] ss:$16 sps:$4 sm:$0xff]  }
  0x9a   : > { %907 = vmatpush1.bf16.msra.mxu1 %v4626_v24  ;;  %828 = vmatprep.subr.bf16.mxu0 %v4635_v27  ;;  %v4680_v63 = vld [vmem:[#allocation5 + $0x1a8] ss:$16 sps:$4 sm:$0xff]   ;;  %v4685_v1 = vld [vmem:[#allocation5 + $0x140] ss:$16 sps:$4 sm:$0xff]   ;;  %v4688_v2 = vld [vmem:[#allocation5 + $0x18c] ss:$16 sps:$4 sm:$0xff]  }
  0x9b   : > { %908 = vmatprep.subr.bf16.mxu1 %v4634_v26  ;;  %850 = vmatprep.mubr.bf16.mxu0 %v351_v57  ;;  %v4689_v3 = vld [vmem:[#allocation5 + $0x124] ss:$16 sps:$4 sm:$0xff]   ;;  %v427_v5 = vld [vmem:[#allocation5 + $0x228] sm:$0x11]  ;;  %v4691_v7 = vld [vmem:[#allocation5 + $0x120] ss:$16 sps:$4 sm:$0xff]  }
  0x9c   : > { %936 = vmatprep.mubr.bf16.mxu1 %v351_v57  ;;  %v4686_v6 = vld [vmem:[#allocation5 + $0x188] ss:$16 sps:$4 sm:$0xff]   ;;  %v4694_v8 = vld [vmem:[#allocation5 + $0x16c] ss:$16 sps:$4 sm:$0xff]   ;;  %v4695_v9 = vld [vmem:[#allocation5 + $0x104] ss:$16 sps:$4 sm:$0xff]   ;;  %v4153_v10 = vcombine.high %v427_v5, %v427_v5  ;;  %v4152_v16 = vcombine.low %v427_v5, %v427_v5 }
  0x9d   : > { %829 = vmatpush1.bf16.msra.mxu0 %v4637_v29  ;;  %v4692_v11 = vld [vmem:[#allocation5 + $0x168] ss:$16 sps:$4 sm:$0xff]   ;;  %v4697_v12 = vld [vmem:[#allocation5 + $0x100] ss:$16 sps:$4 sm:$0xff]   ;;  %v4700_v15 = vld [vmem:[#allocation5 + $0x14c] ss:$16 sps:$4 sm:$0xff]  }
  0x9e   : > { %909 = vmatpush1.bf16.msra.mxu1 %v4632_v28  ;;  %830 = vmatprep.subr.bf16.mxu0 %v4641_v31  ;;  %v344_v13 = vld [vmem:[%s5608_s8] sm:$0xff]  ;;  %v347_v14 = vld [vmem:[%s5608_s8 + $0x18] sm:$0xff]  ;;  %v816_v17 = vand.u32 %v4153_v10, %v5628_v4  ;;  %v813_v23 = vand.u32 %v4152_v16, %v5628_v4  ;;  %s3945_s9 = sshll.u32 %s342_s7, 4  ;;  %s4449_s16 = sshll.u32 %s5463_s27, 8  ;;  %s5891_s9 = int_to_ptr.vmem [resolvable:$true] %s3945_s9 }
  0x9f   : > { %910 = vmatprep.subr.bf16.mxu1 %v4640_v30  ;;  %v4698_v18 = vld [vmem:[#allocation5 + $0x148] ss:$16 sps:$4 sm:$0xff]   ;;  %v350_v20 = vpack.c.bf16 %v347_v14, %v344_v13  ;;  %v4705_v21 = vld [vmem:[#allocation5 + $0x12c] ss:$16 sps:$4 sm:$0xff]   ;;  %v4714_v4 = vld [vmem:[#allocation7 + $0xe4] ss:$16 sps:$4 sm:$0xff]   ;;  %s5896_s14 = scalar_lea.hbm %s5945_s6, %s4449_s16 }
  0xa0   : > { %v4708_v22 = vld [vmem:[#allocation5 + $0x20c] ss:$16 sps:$4 sm:$0xff]   ;;  %v4703_v24 = vld [vmem:[#allocation5 + $0x128] ss:$16 sps:$4 sm:$0xff]   ;;  %v4717_v28 = vld [vmem:[#allocation7 + $0x2e4] ss:$16 sps:$4 sm:$0xff]  }
  0xa1   : > { %831 = vmatpush1.bf16.msra.mxu0 %v4643_v33  ;;  %v4706_v25 = vld [vmem:[#allocation5 + $0x208] ss:$16 sps:$4 sm:$0xff]   ;;  %v4711_v26 = vld [vmem:[#allocation5 + $0x10c] ss:$16 sps:$4 sm:$0xff]   ;;  %v4712_v29 = vld [vmem:[#allocation7 + $0xe0] ss:$16 sps:$4 sm:$0xff]  }
  0xa2   : > { %911 = vmatpush1.bf16.msra.mxu1 %v4638_v32  ;;  %832 = vmatprep.subr.bf16.mxu0 %v4647_v35  ;;  %v4709_v27 = vld [vmem:[#allocation5 + $0x108] ss:$16 sps:$4 sm:$0xff]   ;;  %v4715_v30 = vld [vmem:[#allocation7 + $0x2e0] ss:$16 sps:$4 sm:$0xff]   ;;  %v4720_v31 = vld [vmem:[#allocation7 + $0xc4] ss:$16 sps:$4 sm:$0xff]  }
  0xa3   : > { %912 = vmatprep.subr.bf16.mxu1 %v4646_v34  ;;  %v4723_v32 = vld [vmem:[#allocation7 + $0x2c4] ss:$16 sps:$4 sm:$0xff]   ;;  %v4718_v33 = vld [vmem:[#allocation7 + $0xc0] ss:$16 sps:$4 sm:$0xff]   ;;  %s3932_s10 = scalar_lea.sflag [#allocation4], %s5604_s12  ;;  %s5310_s25 = scalar_lea.vmem %s5891_s9, 256 }
  0xa4   : > { %v4726_v34 = vld [vmem:[#allocation7 + $0xa4] ss:$16 sps:$4 sm:$0xff]   ;;  %v4724_v35 = vld [vmem:[#allocation7 + $0xa0] ss:$16 sps:$4 sm:$0xff]   ;;  %p5311_p10 = scmp.ne.s32.totalorder %s5891_s9, %s5310_s25  ;;  %p5965_p11 = scmp.ne.s32.totalorder %s5954_s30, 0 }
  0xa5   : > { %833 = vmatpush1.bf16.msra.mxu0 %v4649_v37  ;;  %v4732_v37 = vld [vmem:[#allocation7 + $0x84] ss:$16 sps:$4 sm:$0xff]   ;;  %v4751_v52 = vld [vmem:[#allocation7 + $0x220] ss:$16 sps:$4 sm:$0xff]   ;;  %s5404_s27 = smov [#allocation13]  }
  0xa6   : > { %913 = vmatpush1.bf16.msra.mxu1 %v4644_v36  ;;  %834 = vmatprep.subr.bf16.mxu0 %v4653_v39  ;;  %v4727_v36 = vld [vmem:[#allocation7 + $0x2a0] ss:$16 sps:$4 sm:$0xff]   ;;  %v4756_v53 = vld [vmem:[#allocation7 + $0x4] ss:$16 sps:$4 sm:$0xff]   ;;  %p5312_p13 = pnand %p5311_p10, %p5965_p11  ;;  %s5314_s19 = sshll.u32 %s5404_s27, 4  ;;  %s5315_s19 = int_to_ptr.vmem [resolvable:$false] %s5314_s19 }
  0xa7   : > { %914 = vmatprep.subr.bf16.mxu1 %v4652_v38  ;;  %v4735_v38 = vld [vmem:[#allocation7 + $0x284] ss:$16 sps:$4 sm:$0xff]   ;;  %v4730_v39 = vld [vmem:[#allocation7 + $0x80] ss:$16 sps:$4 sm:$0xff]   ;;  %s5316_s26 = scalar_lea.vmem %s5315_s19, 512  ;;  %p5317_p7 = scmp.lt.s32.totalorder %s5891_s9, %s5315_s19 }
  0xa8   : > { %v4762_v57 = vld [vmem:[#allocation7 + $0x1e4] ss:$16 sps:$4 sm:$0xff]   ;;  %v4772_v5 = vld [vmem:[#allocation7 + $0x1a0] ss:$16 sps:$4 sm:$0xff]   ;;  %p5313_p0 = pneg %p5312_p13  ;;  %p5318_p9 = scmp.lt.s32.totalorder %s5316_s26, %s5310_s25 }
  0xa9   : > { %835 = vmatpush2.bf16.msra.mxu0 %v4655_v41  ;;  %v4738_v41 = vld [vmem:[#allocation7 + $0x64] ss:$16 sps:$4 sm:$0xff]   ;;  %v4781_v10 = vld [vmem:[#allocation7 + $0x380] ss:$16 sps:$4 sm:$0xff]  }
  0xaa   : > { %915 = vmatpush1.bf16.msra.mxu1 %v4650_v40  ;;  %836 = vmatprep.subr.bf16.mxu0 %v4659_v43  ;;  %v4733_v40 = vld [vmem:[#allocation7 + $0x280] ss:$16 sps:$4 sm:$0xff]   ;;  %v4792_v16 = vld [vmem:[#allocation7 + $0x144] ss:$16 sps:$4 sm:$0xff]   ;;  %p5319_p1 = por %p5318_p9, %p5317_p7 }
  0xab   : > { %916 = vmatprep.subr.bf16.mxu1 %v4658_v42  ;;  %v4741_v42 = vld [vmem:[#allocation7 + $0x264] ss:$16 sps:$4 sm:$0xff]   ;;  %v4736_v43 = vld [vmem:[#allocation7 + $0x60] ss:$16 sps:$4 sm:$0xff]  }
  0xac   : > { %v4784_v13 = vld [vmem:[#allocation7 + $0x160] ss:$16 sps:$4 sm:$0xff]   ;;  %p5320_p3 = pnand %p5319_p1, %p5313_p0 }
  0xad   : > { %837 = vmatpush2.bf16.msra.mxu0 %v4661_v45  ;;  %v4744_v45 = vld [vmem:[#allocation7 + $0x44] ss:$16 sps:$4 sm:$0xff]   ;;  %v4787_v14 = vld [vmem:[#allocation7 + $0x360] ss:$16 sps:$4 sm:$0xff]  }
  0xae   : > { %917 = vmatpush1.bf16.msra.mxu1 %v4656_v44  ;;  %838 = vmatprep.subr.bf16.mxu0 %v4665_v47  ;;  %v4739_v44 = vld [vmem:[#allocation7 + $0x260] ss:$16 sps:$4 sm:$0xff]  }
  0xaf   : > { %918 = vmatprep.subr.bf16.mxu1 %v4664_v46  ;;  %v4742_v46 = vld [vmem:[#allocation7 + $0x40] ss:$16 sps:$4 sm:$0xff]  }
  0xb0   : > { %v4745_v47 = vld [vmem:[#allocation7 + $0x240] ss:$16 sps:$4 sm:$0xff]  }
  0xb1   : > { %839 = vmatpush2.bf16.msra.mxu0 %v4667_v49  ;;  %v4750_v49 = vld [vmem:[#allocation7 + $0x24] ss:$16 sps:$4 sm:$0xff]  }
  0xb2   : > { %919 = vmatpush1.bf16.msra.mxu1 %v4662_v48  ;;  %840 = vmatprep.subr.bf16.mxu0 %v4671_v51  ;;  %v4747_v48 = vld [vmem:[#allocation7 + $0x244] ss:$16 sps:$4 sm:$0xff]   ;;  %v4748_v51 = vld [vmem:[#allocation7 + $0x20] ss:$16 sps:$4 sm:$0xff]  }
  0xb3   : > { %920 = vmatprep.subr.bf16.mxu1 %v4670_v50  ;;  %v4753_v50 = vld [vmem:[#allocation7 + $0x224] ss:$16 sps:$4 sm:$0xff]  }
  0xb5   : > { %841 = vmatpush2.bf16.msra.mxu0 %v4673_v55  ;;  %v4754_v55 = vld [vmem:[#allocation7] ss:$16 sps:$4 sm:$0xff]  }
  0xb6   : > { %921 = vmatpush2.bf16.msra.mxu1 %v4668_v54  ;;  %842 = vmatprep.subr.bf16.mxu0 %v4677_v58  ;;  %v4759_v54 = vld [vmem:[#allocation7 + $0x204] ss:$16 sps:$4 sm:$0xff]  }
  0xb7   : > { %922 = vmatprep.subr.bf16.mxu1 %v4676_v56  ;;  %v4757_v56 = vld [vmem:[#allocation7 + $0x200] ss:$16 sps:$4 sm:$0xff]   ;;  %v4765_v58 = vld [vmem:[#allocation7 + $0x3e4] ss:$16 sps:$4 sm:$0xff]  }
  0xb9   : > { %843 = vmatpush2.bf16.msra.mxu0 %v4679_v60  ;;  %v4763_v60 = vld [vmem:[#allocation7 + $0x3e0] ss:$16 sps:$4 sm:$0xff]  }
  0xba   : > { %923 = vmatpush2.bf16.msra.mxu1 %v4674_v59  ;;  %844 = vmatprep.subr.bf16.mxu0 %v4683_v62  ;;  %v4760_v59 = vld [vmem:[#allocation7 + $0x1e0] ss:$16 sps:$4 sm:$0xff]   ;;  %v4771_v62 = vld [vmem:[#allocation7 + $0x3c4] ss:$16 sps:$4 sm:$0xff]  }
  0xbb   : > { %924 = vmatprep.subr.bf16.mxu1 %v4682_v61  ;;  %v4768_v61 = vld [vmem:[#allocation7 + $0x1c4] ss:$16 sps:$4 sm:$0xff]  }
  0xbd   : > { %845 = vmatpush2.bf16.msra.mxu0 %v4685_v1  ;;  %v4769_v1 = vld [vmem:[#allocation7 + $0x3c0] ss:$16 sps:$4 sm:$0xff]  }
  0xbe   : > { %925 = vmatpush2.bf16.msra.mxu1 %v4680_v63  ;;  %846 = vmatprep.subr.bf16.mxu0 %v4689_v3  ;;  %v4766_v63 = vld [vmem:[#allocation7 + $0x1c0] ss:$16 sps:$4 sm:$0xff]   ;;  %v4777_v3 = vld [vmem:[#allocation7 + $0x3a4] ss:$16 sps:$4 sm:$0xff]  }
  0xbf   : > { %926 = vmatprep.subr.bf16.mxu1 %v4688_v2  ;;  %v4774_v2 = vld [vmem:[#allocation7 + $0x1a4] ss:$16 sps:$4 sm:$0xff]  }
  0xc1   : > { %847 = vmatpush2.bf16.msra.mxu0 %v4691_v7  ;;  %v4780_v7 = vld [vmem:[#allocation7 + $0x184] ss:$16 sps:$4 sm:$0xff]  }
  0xc2   : > { %927 = vmatpush2.bf16.msra.mxu1 %v4686_v6  ;;  %848 = vmatprep.subr.bf16.mxu0 %v4695_v9  ;;  %v4775_v6 = vld [vmem:[#allocation7 + $0x3a0] ss:$16 sps:$4 sm:$0xff]  }
  0xc3   : > { %928 = vmatprep.subr.bf16.mxu1 %v4694_v8  ;;  %v4783_v8 = vld [vmem:[#allocation7 + $0x384] ss:$16 sps:$4 sm:$0xff]   ;;  %v4778_v9 = vld [vmem:[#allocation7 + $0x180] ss:$16 sps:$4 sm:$0xff]  }
  0xc5   : > { %849 = vmatpush2.bf16.msra.mxu0 %v4697_v12  ;;  %v4789_v12 = vld [vmem:[#allocation7 + $0x364] ss:$16 sps:$4 sm:$0xff]  }
  0xc6   : > { %929 = vmatpush2.bf16.msra.mxu1 %v4692_v11  ;;  %959 = vmatprep.subr.bf16.mxu0 %v816_v17  ;;  %v4786_v11 = vld [vmem:[#allocation7 + $0x164] ss:$16 sps:$4 sm:$0xff]   ;;  %v4793_v17 = vld [vmem:[#allocation7 + $0x340] ss:$16 sps:$4 sm:$0xff]  }
  0xc7   : > { %930 = vmatprep.subr.bf16.mxu1 %v4700_v15  ;;  %v4790_v15 = vld [vmem:[#allocation7 + $0x140] ss:$16 sps:$4 sm:$0xff]  }
  0xc8   : > { %851 = vmatmul.mubr.bf16.vlgmr.msra.gmra.mxu0 %v350_v20 }
  0xc9   : > { %960 = vmatpush1.bf16.msra.mxu0 %v813_v23  ;;  %979 = vmatprep.mubr.bf16.mxu0 %v5402_v0  ;;  %v4721_v0 = vld [vmem:[#allocation7 + $0x2c0] ss:$16 sps:$4 sm:$0xff]  }
  0xca   : > { %931 = vmatpush2.bf16.msra.mxu1 %v4698_v18  ;;  %961 = vmatprep.subr.bf16.mxu0 %v4708_v22  ;;  %v4795_v18 = vld [vmem:[#allocation7 + $0x344] ss:$16 sps:$4 sm:$0xff]   ;;  %v4796_v22 = vld [vmem:[#allocation7 + $0x120] ss:$16 sps:$4 sm:$0xff]  }
  0xcb   : > { %932 = vmatprep.subr.bf16.mxu1 %v4705_v21  ;;  %v4801_v21 = vld [vmem:[#allocation7 + $0x324] ss:$16 sps:$4 sm:$0xff]   ;;  %v4799_v23 = vld [vmem:[#allocation7 + $0x320] ss:$16 sps:$4 sm:$0xff]  }
  0xcd   : > { %962 = vmatpush1.bf16.msra.mxu0 %v4706_v25  ;;  %v4807_v25 = vld [vmem:[#allocation7 + $0x304] ss:$16 sps:$4 sm:$0xff]  }
  0xce   : > { %933 = vmatpush2.bf16.msra.mxu1 %v4703_v24  ;;  %2007 = vmatprep.subr.bf16.mxu0 %v4714_v4  ;;  %v4804_v24 = vld [vmem:[#allocation7 + $0x104] ss:$16 sps:$4 sm:$0xff]   ;;  %v4810_v4 = vld [vmem:[#allocation7 + $0xec] ss:$16 sps:$4 sm:$0xff]  }
  0xcf   : > { %934 = vmatprep.subr.bf16.mxu1 %v4711_v26  ;;  %v4802_v26 = vld [vmem:[#allocation7 + $0x100] ss:$16 sps:$4 sm:$0xff]  }
  0xd0   : > { %4155 = vmatmul.mubr.msk.bf16.vlgmr.msra.gmra.mxu0 %vm799_vm1, %v5634_v19  ;;  %v4729_v19 = vld [vmem:[#allocation7 + $0x2a4] ss:$16 sps:$4 sm:$0xff]  }
  0xd1   : > { %2008 = vmatpush1.bf16.msra.mxu0 %v4712_v29  ;;  %v429_v29 = vlaneseq }
  0xd2   : > { %935 = vmatpush2.bf16.msra.mxu1 %v4709_v27  ;;  %2009 = vmatprep.subr.bf16.mxu0 %v4720_v31  ;;  %v4805_v27 = vld [vmem:[#allocation7 + $0x300] ss:$16 sps:$4 sm:$0xff]  }
  0xd3   : > { %2050 = vmatprep.subr.bf16.mxu1 %v4717_v28  ;;  %v4813_v28 = vld [vmem:[#allocation7 + $0x2ec] ss:$16 sps:$4 sm:$0xff]  }
  0xd5   : > { %937 = vmatmul.mubr.bf16.vlgmr.msra.gmra.mxu1 %v350_v20  ;;  %2010 = vmatpush1.bf16.msra.mxu0 %v4718_v33  ;;  %v4798_v20 = vld [vmem:[#allocation7 + $0x124] ss:$16 sps:$4 sm:$0xff]  }
  0xd6   : > { %2051 = vmatpush1.bf16.msra.mxu1 %v4715_v30  ;;  %2011 = vmatprep.subr.bf16.mxu0 %v4726_v34  ;;  %v5647_v30 = vshrl.u32 %v429_v29, 7 }
  0xd7   : > { %2052 = vmatprep.subr.bf16.mxu1 %v4723_v32  ;;  %v353_v32 = vld [vmem:[#allocation11] ss:$8 sm:$0xf] }
  0xd8   : > { %v5650_v31 = vsub.s32 0, %v5647_v30  ;;  %v5653_v33 = vsub.s32 1, %v5647_v30 }
  0xd9   : > { %2012 = vmatpush1.bf16.msra.mxu0 %v4724_v35 }
  0xda   : > { %2053 = vmatpush1.bf16.msra.mxu1 %v4721_v0  ;;  %2013 = vmatprep.subr.bf16.mxu0 %v4732_v37  ;;  %v432_v34 = vrot.slane %v353_v32, %v5650_v31 }
  0xdb   : > { %2054 = vmatprep.subr.bf16.mxu1 %v4729_v19  ;;  %v436_v19 = vrot.slane %v353_v32, %v5653_v33 }
  0xdd   : > { %2014 = vmatpush1.bf16.msra.mxu0 %v4730_v39 }
  0xde   : > { %2055 = vmatpush1.bf16.msra.mxu1 %v4727_v36  ;;  %2015 = vmatprep.subr.bf16.mxu0 %v4738_v41 }
  0xdf   : > { %2056 = vmatprep.subr.bf16.mxu1 %v4735_v38 }
  0xe1   : > { %2016 = vmatpush1.bf16.msra.mxu0 %v4736_v43 }
  0xe2   : > { %2057 = vmatpush1.bf16.msra.mxu1 %v4733_v40  ;;  %2017 = vmatprep.subr.bf16.mxu0 %v4744_v45  ;;  %v5658_v45 = vsub.s32 2, %v5647_v30 }
  0xe3   : > { %2058 = vmatprep.subr.bf16.mxu1 %v4741_v42 }
  0xe5   : > { %2018 = vmatpush1.bf16.msra.mxu0 %v4742_v46 }
  0xe6   : > { %2059 = vmatpush1.bf16.msra.mxu1 %v4739_v44  ;;  %2019 = vmatprep.subr.bf16.mxu0 %v4750_v49  ;;  %v5661_v49 = vsub.s32 3, %v5647_v30 }
  0xe7   : > { %2060 = vmatprep.subr.bf16.mxu1 %v4747_v48 }
  0xe9   : > { %2020 = vmatpush1.bf16.msra.mxu0 %v4748_v51 }
  0xea   : > { %2061 = vmatpush1.bf16.msra.mxu1 %v4745_v47  ;;  %2021 = vmatprep.subr.bf16.mxu0 %v4756_v53 }
  0xeb   : > { %2062 = vmatprep.subr.bf16.mxu1 %v4753_v50 }
  0xed   : > { %2022 = vmatpush1.bf16.msra.mxu0 %v4754_v55  ;;  %v440_v55 = vrot.slane %v353_v32, %v5658_v45 }
  0xee   : > { %2063 = vmatpush1.bf16.msra.mxu1 %v4751_v52  ;;  %2023 = vmatprep.subr.bf16.mxu0 %v4762_v57 }
  0xef   : > { %2064 = vmatprep.subr.bf16.mxu1 %v4759_v54 }
  0xf1   : > { %2024 = vmatpush2.bf16.msra.mxu0 %v4760_v59  ;;  %v444_v59 = vrot.slane %v353_v32, %v5661_v49 }
  0xf2   : > { %2065 = vmatpush1.bf16.msra.mxu1 %v4757_v56  ;;  %2025 = vmatprep.subr.bf16.mxu0 %v4768_v61 }
  0xf3   : > { %2066 = vmatprep.subr.bf16.mxu1 %v4765_v58 }
  0xf5   : > { %2026 = vmatpush2.bf16.msra.mxu0 %v4766_v63 }
  0xf6   : > { %2067 = vmatpush2.bf16.msra.mxu1 %v4763_v60  ;;  %2027 = vmatprep.subr.bf16.mxu0 %v4774_v2 }
  0xf7   : > { %2068 = vmatprep.subr.bf16.mxu1 %v4771_v62 }
  0xf9   : > { %2028 = vmatpush2.bf16.msra.mxu0 %v4772_v5 }
  0xfa   : > { %2069 = vmatpush2.bf16.msra.mxu1 %v4769_v1  ;;  %2029 = vmatprep.subr.bf16.mxu0 %v4780_v7 }
  0xfb   : > { %2070 = vmatprep.subr.bf16.mxu1 %v4777_v3 }
  0xfd   : > { %2030 = vmatpush2.bf16.msra.mxu0 %v4778_v9 }
  0xfe   : > { %2071 = vmatpush2.bf16.msra.mxu1 %v4775_v6  ;;  %2031 = vmatprep.subr.bf16.mxu0 %v4786_v11 }
  0xff   : > { %2072 = vmatprep.subr.bf16.mxu1 %v4783_v8 }
 0x101   : > { %2032 = vmatpush2.bf16.msra.mxu0 %v4784_v13 }
 0x102   : > { %2073 = vmatpush2.bf16.msra.mxu1 %v4781_v10  ;;  %2033 = vmatprep.subr.bf16.mxu0 %v4792_v16 }
 0x103   : > { %2074 = vmatprep.subr.bf16.mxu1 %v4789_v12 }
 0x105   : > { %2034 = vmatpush2.bf16.msra.mxu0 %v4790_v15 }
 0x106   : > { %2075 = vmatpush2.bf16.msra.mxu1 %v4787_v14  ;;  %2035 = vmatprep.subr.bf16.mxu0 %v4798_v20 }
 0x107   : > { %2076 = vmatprep.subr.bf16.mxu1 %v4795_v18 }
 0x109   : > { %2036 = vmatpush2.bf16.msra.mxu0 %v4796_v22 }
 0x10a   : > { %2077 = vmatpush2.bf16.msra.mxu1 %v4793_v17  ;;  %2037 = vmatprep.subr.bf16.mxu0 %v4804_v24 }
 0x10b   : > { %2078 = vmatprep.subr.bf16.mxu1 %v4801_v21 }
 0x10d   : > { %2038 = vmatpush2.bf16.msra.mxu0 %v4802_v26 }
 0x10e   : > { %2079 = vmatpush2.bf16.msra.mxu1 %v4799_v23  ;;  %2093 = vmatprep.subr.bf16.mxu0 %v4810_v4 }
 0x10f   : > { %2080 = vmatprep.subr.bf16.mxu1 %v4807_v25 }
 0x112   : > { %2081 = vmatpush2.bf16.msra.mxu1 %v4805_v27 }
 0x113   : > { %2136 = vmatprep.subr.bf16.mxu1 %v4813_v28 }
 0x155   : > { %v895_v0 = vpop.f32.mrf.mxu1 }
 0x157   : > { %v897_v35 = vpop.f32.mrf.mxu1 }
 0x159   : > { %v899_v40 = vpop.f32.mrf.mxu1 }
 0x15b   : > { %v901_v50 = vpop.f32.mrf.mxu1 }
 0x188   : > { %v852_v36 = vpop.f32.mrf.mxu0 }
 0x189   : > { %v853_v37 = vadd.f32 %v852_v36, %v432_v34 }
 0x18a   : > { %v854_v38 = vpop.f32.mrf.mxu0 }
 0x18b   : > { %v855_v39 = vadd.f32 %v854_v38, %v436_v19  ;;  %v896_v42 = vadd.f32 %v895_v0, %v853_v37 }
 0x18c   : > { %v856_v41 = vpop.f32.mrf.mxu0 }
 0x18d   : > { %v857_v43 = vadd.f32 %v856_v41, %v432_v34  ;;  %v898_v46 = vadd.f32 %v897_v35, %v855_v39  ;;  %v5663_v52 = vmax.f32 %v896_v42, 0.0 }
 0x18e   : > { %v858_v44 = vpop.f32.mrf.mxu0 }
 0x18f   : > { %v900_v47 = vadd.f32 %v899_v40, %v857_v43  ;;  %v859_v48 = vadd.f32 %v858_v44, %v436_v19  ;;  %v5668_v56 = vmax.f32 %v898_v46, 0.0 }
 0x190   : > { %v981_v51 = vpop.f32.mrf.mxu0 }
 0x191   : > { %v5665_v53 = vmax.f32 %v900_v47, 0.0  ;;  %v902_v54 = vadd.f32 %v901_v50, %v859_v48 }
 0x192   : > { %v983_v61 = vpop.f32.mrf.mxu0 }
 0x193   : > { %v998_v57 = vadd.f32 %v5665_v53, %v5663_v52  ;;  %v5672_v58 = vmax.f32 %v902_v54, 0.0 }
 0x194   : > { %v985_v7 = vpop.f32.mrf.mxu0 }
 0x195   : > { %v938_v60 = vpop.f32.mrf.mxu1  ;;  %v999_v62 = vrot.slane %v998_v57, 4  ;;  %v1005_v63 = vadd.f32 %v5672_v58, %v5668_v56 }
 0x196   : > { %v939_v1 = vadd.f32 %v938_v60, %v440_v55  ;;  %v987_v20 = vpop.f32.mrf.mxu0 }
 0x197   : > { %v940_v2 = vpop.f32.mrf.mxu1  ;;  %v1000_v3 = vadd.f32 %v999_v62, %v998_v57  ;;  %v1006_v5 = vrot.slane %v1005_v63, 4 }
 0x198   : > { %v941_v6 = vadd.f32 %v940_v2, %v444_v59  ;;  %v982_v11 = vadd.f32 %v981_v51, %v939_v1 }
 0x199   : > { %v942_v8 = vpop.f32.mrf.mxu1  ;;  %v1001_v9 = vrot.slane %v1000_v3, 2  ;;  %v1007_v10 = vadd.f32 %v1006_v5, %v1005_v63 }
 0x19a   : > { %v943_v12 = vadd.f32 %v942_v8, %v440_v55  ;;  %v984_v16 = vadd.f32 %v983_v61, %v941_v6  ;;  %v5677_v24 = vmax.f32 %v982_v11, 0.0 }
 0x19b   : > { %v944_v13 = vpop.f32.mrf.mxu1  ;;  %v1002_v14 = vadd.f32 %v1001_v9, %v1000_v3  ;;  %v1008_v15 = vrot.slane %v1007_v10, 2 }
 0x19c   : > { %v945_v17 = vadd.f32 %v944_v13, %v444_v59  ;;  %v986_v18 = vadd.f32 %v985_v7, %v943_v12  ;;  %v5681_v4 = vmax.f32 %v984_v16, 0.0 }
 0x19d   : > { %v1003_v21 = vrot.slane %v1002_v14, 1  ;;  %v1009_v22 = vadd.f32 %v1008_v15, %v1007_v10 }
 0x19e   : > { %v988_v23 = vadd.f32 %v987_v20, %v945_v17  ;;  %v5679_v25 = vmax.f32 %v986_v18, 0.0 }
 0x19f   : > { %v1004_v26 = vadd.f32 %v1003_v21, %v1002_v14  ;;  %v1010_v27 = vrot.slane %v1009_v22, 1 }
 0x1a0   : > { %v5683_v28 = vmax.f32 %v988_v23, 0.0  ;;  %v1012_v29 = vadd.f32 %v5679_v25, %v5677_v24 }
 0x1a1   : > { %v5687_v32 = vmul.f32 0.0625, %v1004_v26  ;;  %v1011_v0 = vadd.f32 %v1010_v27, %v1009_v22 }
 0x1a2   : > { %v1019_v34 = vadd.f32 %v5683_v28, %v5681_v4  ;;  %v1013_v19 = vrot.slane %v1012_v29, 4 }
 0x1a3   : > { %v1030_v35 = vsub.f32 %v5663_v52, %v5687_v32  ;;  %v1034_v36 = vsub.f32 %v5665_v53, %v5687_v32  ;;  %v5695_v37 = vmul.f32 0.0625, %v1011_v0 }
 0x1a4   : > { %v1020_v38 = vrot.slane %v1019_v34, 4  ;;  %v1014_v39 = vadd.f32 %v1013_v19, %v1012_v29 }
 0x1a5   : > { %v1038_v40 = vmul.f32 %v1030_v35, %v1030_v35  ;;  %v1042_v41 = vmul.f32 %v1034_v36, %v1034_v36  ;;  %v1031_v42 = vsub.f32 %v5668_v56, %v5695_v37  ;;  %v1035_v43 = vsub.f32 %v5672_v58, %v5695_v37 }
 0x1a6   : > { %v1015_v44 = vrot.slane %v1014_v39, 2  ;;  %v1021_v46 = vadd.f32 %v1020_v38, %v1019_v34 }
 0x1a7   : > { %v1046_v47 = vadd.f32 %v1042_v41, %v1038_v40  ;;  %v1039_v48 = vmul.f32 %v1031_v42, %v1031_v42  ;;  %v1043_v50 = vmul.f32 %v1035_v43, %v1035_v43 }
 0x1a8   : > { %v1016_v51 = vadd.f32 %v1015_v44, %v1014_v39  ;;  %v1022_v54 = vrot.slane %v1021_v46, 2 }
 0x1a9   : > { %v1047_v55 = vrot.slane %v1046_v47, 4  ;;  %v1053_v57 = vadd.f32 %v1043_v50, %v1039_v48 }
 0x1aa   : > { %v1017_v59 = vrot.slane %v1016_v51, 1  ;;  %v1023_v60 = vadd.f32 %v1022_v54, %v1021_v46 }
 0x1ab   : > { %v1048_v61 = vadd.f32 %v1047_v55, %v1046_v47  ;;  %v1054_v62 = vrot.slane %v1053_v57, 4 }
 0x1ac   : > { %v1018_v63 = vadd.f32 %v1017_v59, %v1016_v51  ;;  %v1024_v1 = vrot.slane %v1023_v60, 1 }
 0x1ad   : > { %v1049_v2 = vrot.slane %v1048_v61, 2  ;;  %v1055_v3 = vadd.f32 %v1054_v62, %v1053_v57  ;;  %v5403_v57 = vmov 1966171168  }
 0x1ae   : > { %v5701_v5 = vmul.f32 0.0625, %v1018_v63  ;;  %v1025_v6 = vadd.f32 %v1024_v1, %v1023_v60  ;;  %v1093_v59 = vunpack.c.l.s4 %v5403_v57 }
 0x1af   : > { %v1056_v7 = vrot.slane %v1055_v3, 2  ;;  %v1050_v11 = vadd.f32 %v1049_v2, %v1048_v61 }
 0x1b0   : > { %v1032_v8 = vsub.f32 %v5677_v24, %v5701_v5  ;;  %v1036_v9 = vsub.f32 %v5679_v25, %v5701_v5  ;;  %v1029_v10 = vmul.f32 0.0625, %v1025_v6  ;;  %v1094_v60 = vunpack.c.0.s8 %v1093_v59  ;;  %v4817_v59 = vld [vmem:[#allocation7 + $0x2c8] ss:$16 sps:$4 sm:$0xff]  }
 0x1b1   : > { %v1057_v12 = vadd.f32 %v1056_v7, %v1055_v3  ;;  %v1051_v22 = vrot.slane %v1050_v11, 1 }
 0x1b2   : > { %v1040_v13 = vmul.f32 %v1032_v8, %v1032_v8  ;;  %v1044_v14 = vmul.f32 %v1036_v9, %v1036_v9  ;;  %v1033_v15 = vsub.f32 %v5681_v4, %v1029_v10  ;;  %v1037_v16 = vsub.f32 %v5683_v28, %v1029_v10 }
 0x1b3   : > { %v1058_v17 = vrot.slane %v1057_v12, 1  ;;  %v1052_v34 = vadd.f32 %v1051_v22, %v1050_v11  ;;  %v5710_v1 = vsub.s32 %v1094_v60, %v5647_v30  ;;  %v355_v11 = vld [vmem:[#allocation11 + $0x1] ss:$8 sm:$0xf]  ;;  %v4822_v60 = vld [vmem:[#allocation7 + $0xac] ss:$16 sps:$4 sm:$0xff]  }
 0x1b4   : > { %v1060_v18 = vadd.f32 %v1044_v14, %v1040_v13  ;;  %v1041_v20 = vmul.f32 %v1033_v15, %v1033_v15  ;;  %v1045_v21 = vmul.f32 %v1037_v16, %v1037_v16 }
 0x1b5   : > { %v1059_v27 = vadd.f32 %v1058_v17, %v1057_v12  ;;  %v1074_v40 = vmul.f32 0.0625, %v1052_v34 }
 0x1b6   : > { %v1061_v23 = vrot.slane %v1060_v18, 4  ;;  %v1067_v26 = vadd.f32 %v1045_v21, %v1041_v20 }
 0x1b7   : > { %v1075_v36 = vmul.f32 0.0625, %v1059_v27  ;;  %v1078_v47 = vadd.f32 1e-05, %v1074_v40 }
 0x1b8   : > { %v1062_v29 = vadd.f32 %v1061_v23, %v1060_v18  ;;  %v1068_v0 = vrot.slane %v1067_v26, 4 }
 0x1b9   : > { %v1079_v43 = vadd.f32 1e-05, %v1075_v36 }
 0x1ba   : > { %v1063_v19 = vrot.slane %v1062_v29, 2  ;;  %v1069_v35 = vadd.f32 %v1068_v0, %v1067_v26  ;;  %v357_v0 = vld [vmem:[#allocation11 + $0x2] ss:$8 sm:$0xf] }
 0x1bb   : > { %5128 = vrsqrt.f32 %v1079_v43 }
 0x1bc   : > { %v1064_v38 = vadd.f32 %v1063_v19, %v1062_v29  ;;  %v1070_v39 = vrot.slane %v1069_v35, 2  ;;  %5130 = vrsqrt.f32 %v1078_v47 }
 0x1be   : > { %v1065_v41 = vrot.slane %v1064_v38, 1  ;;  %v1071_v42 = vadd.f32 %v1070_v39, %v1069_v35 }
 0x1c0   : > { %v1066_v44 = vadd.f32 %v1065_v41, %v1064_v38  ;;  %v1072_v46 = vrot.slane %v1071_v42, 1 }
 0x1c2   : > { %v1076_v48 = vmul.f32 0.0625, %v1066_v44  ;;  %v1073_v50 = vadd.f32 %v1072_v46, %v1071_v42 }
 0x1c4   : > { %v1080_v51 = vadd.f32 1e-05, %v1076_v48  ;;  %v1077_v54 = vmul.f32 0.0625, %v1073_v50 }
 0x1c6   : > { %v1081_v55 = vadd.f32 1e-05, %v1077_v54  ;;  %5132 = vrsqrt.f32 %v1080_v51  ;;  %v4808_v54 = vld [vmem:[#allocation7 + $0xe8] ss:$16 sps:$4 sm:$0xff]  }
 0x1c8   : > { %5134 = vrsqrt.f32 %v1081_v55  ;;  %v5129_v61 = vpop.eup %5128  ;;  %v4811_v55 = vld [vmem:[#allocation7 + $0x2e8] ss:$16 sps:$4 sm:$0xff]  }
 0x1c9   : > { %v5131_v62 = vpop.eup %5130 }
 0x1ca   : > { %v1090_v2 = vcombine.low %v5131_v62, %v5129_v61  ;;  %v4825_v61 = vld [vmem:[#allocation7 + $0x2ac] ss:$16 sps:$4 sm:$0xff]   ;;  %v4820_v62 = vld [vmem:[#allocation7 + $0xa8] ss:$16 sps:$4 sm:$0xff]  }
 0x1cc   : > { %v1098_v7 = vrot.slane %v1090_v2, %v5710_v1  ;;  %v4828_v2 = vld [vmem:[#allocation7 + $0x8c] ss:$16 sps:$4 sm:$0xff]  }
 0x1d3   : > { %v5133_v63 = vpop.eup %5132 }
 0x1d5   : > { %v5135_v3 = vpop.eup %5134 }
 0x1d6   : > { %v1091_v6 = vcombine.low %v5133_v63, %v5135_v3  ;;  %v4823_v63 = vld [vmem:[#allocation7 + $0x2a8] ss:$16 sps:$4 sm:$0xff]   ;;  %v4831_v3 = vld [vmem:[#allocation7 + $0x28c] ss:$16 sps:$4 sm:$0xff]  }
 0x1d8   : > { %v1105_v8 = vrot.slane %v1091_v6, %v5710_v1  ;;  %v4826_v6 = vld [vmem:[#allocation7 + $0x88] ss:$16 sps:$4 sm:$0xff]  }
 0x1da   : > { %v1106_v9 = vcombine.low %v1098_v7, %v1105_v8  ;;  %v4829_v7 = vld [vmem:[#allocation7 + $0x288] ss:$16 sps:$4 sm:$0xff]   ;;  %v4834_v8 = vld [vmem:[#allocation7 + $0x6c] ss:$16 sps:$4 sm:$0xff]  }
 0x1dc   : > { %v1113_v12 = vrot.slane %v1106_v9, %v5710_v1  ;;  %v4837_v9 = vld [vmem:[#allocation7 + $0x26c] ss:$16 sps:$4 sm:$0xff]  }
 0x1de   : > { %v1115_v13 = vmul.f32 %v1113_v12, %v355_v11  ;;  %v4832_v11 = vld [vmem:[#allocation7 + $0x68] ss:$16 sps:$4 sm:$0xff]  }
 0x1df   : > { %v4835_v12 = vld [vmem:[#allocation7 + $0x268] ss:$16 sps:$4 sm:$0xff]  }
 0x1e0   : > { %v1128_v14 = vrot.slane %v1115_v13, %v5658_v45  ;;  %v1132_v15 = vrot.slane %v1115_v13, %v5661_v49  ;;  %v1120_v16 = vrot.slane %v1115_v13, %v5650_v31  ;;  %v1124_v30 = vrot.slane %v1115_v13, %v5653_v33  ;;  %v4840_v13 = vld [vmem:[#allocation7 + $0x4c] ss:$16 sps:$4 sm:$0xff]  }
 0x1e2   : > { %v1139_v17 = vmul.f32 %v1128_v14, %v5701_v5  ;;  %v1140_v18 = vmul.f32 %v1132_v15, %v1029_v10  ;;  %v1137_v20 = vmul.f32 %v1120_v16, %v5687_v32  ;;  %v1138_v21 = vmul.f32 %v1124_v30, %v5695_v37 }
 0x1e3   : > { %v1178_v35 = vmul.f32 %v1132_v15, %v5683_v28  ;;  %v1172_v5 = vmul.f32 %v1124_v30, %v5668_v56  ;;  %v1176_v10 = vmul.f32 %v1124_v30, %v5672_v58  ;;  %v1174_v32 = vmul.f32 %v1132_v15, %v5681_v4  ;;  %v4838_v15 = vld [vmem:[#allocation7 + $0x48] ss:$16 sps:$4 sm:$0xff]   ;;  %v4846_v30 = vld [vmem:[#allocation7 + $0x2c] ss:$16 sps:$4 sm:$0xff]  }
 0x1e4   : > { %v1146_v22 = vcombine.low %v1139_v17, %v1140_v18  ;;  %v1145_v23 = vcombine.low %v1137_v20, %v1138_v21  ;;  %v1171_v40 = vmul.f32 %v1120_v16, %v5663_v52  ;;  %v1175_v41 = vmul.f32 %v1120_v16, %v5665_v53  ;;  %v4816_v53 = vld [vmem:[#allocation7 + $0xcc] ss:$16 sps:$4 sm:$0xff]   ;;  %v4841_v16 = vld [vmem:[#allocation7 + $0x248] ss:$16 sps:$4 sm:$0xff]  }
 0x1e5   : > { %v1173_v28 = vmul.f32 %v1128_v14, %v5677_v24  ;;  %v1177_v56 = vmul.f32 %v1128_v14, %v5679_v25  ;;  %v4819_v24 = vld [vmem:[#allocation7 + $0x2cc] ss:$16 sps:$4 sm:$0xff]   ;;  %v4814_v25 = vld [vmem:[#allocation7 + $0xc8] ss:$16 sps:$4 sm:$0xff]  }
 0x1e6   : > { %v1160_v26 = vrot.slane %v1146_v22, %v5710_v1  ;;  %v1153_v27 = vrot.slane %v1145_v23, %v5710_v1  ;;  %v4843_v14 = vld [vmem:[#allocation7 + $0x24c] ss:$16 sps:$4 sm:$0xff]   ;;  %v4844_v18 = vld [vmem:[#allocation7 + $0x28] ss:$16 sps:$4 sm:$0xff]  }
 0x1e7   : > { %v4849_v17 = vld [vmem:[#allocation7 + $0x22c] ss:$16 sps:$4 sm:$0xff]   ;;  %v4847_v20 = vld [vmem:[#allocation7 + $0x228] ss:$16 sps:$4 sm:$0xff]  }
 0x1e8   : > { %v1161_v29 = vcombine.low %v1153_v27, %v1160_v26  ;;  %v4852_v21 = vld [vmem:[#allocation7 + $0xc] ss:$16 sps:$4 sm:$0xff]   ;;  %v4850_v23 = vld [vmem:[#allocation7 + $0x8] ss:$16 sps:$4 sm:$0xff]  }
 0x1e9   : > { %v4855_v22 = vld [vmem:[#allocation7 + $0x20c] ss:$16 sps:$4 sm:$0xff]   ;;  %v4853_v26 = vld [vmem:[#allocation7 + $0x208] ss:$16 sps:$4 sm:$0xff]  }
 0x1ea   : > { %v1168_v34 = vrot.slane %v1161_v29, %v5710_v1  ;;  %v4858_v27 = vld [vmem:[#allocation7 + $0x1ec] ss:$16 sps:$4 sm:$0xff]  }
 0x1eb   : > { %v4861_v29 = vld [vmem:[#allocation7 + $0x3ec] ss:$16 sps:$4 sm:$0xff]  }
 0x1ec   : > { %v1170_v19 = vsub.f32 %v357_v0, %v1168_v34  ;;  %v4856_v0 = vld [vmem:[#allocation7 + $0x1e8] ss:$16 sps:$4 sm:$0xff]  }
 0x1ed   : > { %v4859_v34 = vld [vmem:[#allocation7 + $0x3e8] ss:$16 sps:$4 sm:$0xff]  }
 0x1ee   : > { %v1187_v37 = vrot.slane %v1170_v19, %v5653_v33  ;;  %v1195_v36 = vrot.slane %v1170_v19, %v5661_v49  ;;  %v1183_v38 = vrot.slane %v1170_v19, %v5650_v31  ;;  %v1191_v39 = vrot.slane %v1170_v19, %v5658_v45  ;;  %v4864_v19 = vld [vmem:[#allocation7 + $0x1cc] ss:$16 sps:$4 sm:$0xff]  }
 0x1f0   : > { %v1201_v42 = vadd.f32 %v1187_v37, %v1172_v5  ;;  %v1205_v58 = vadd.f32 %v1187_v37, %v1176_v10  ;;  %v1203_v43 = vadd.f32 %v1195_v36, %v1174_v32  ;;  %v1207_v4 = vadd.f32 %v1195_v36, %v1178_v35  ;;  %v4867_v35 = vld [vmem:[#allocation7 + $0x3cc] ss:$16 sps:$4 sm:$0xff]   ;;  %v4862_v5 = vld [vmem:[#allocation7 + $0x1c8] ss:$16 sps:$4 sm:$0xff]  }
 0x1f1   : > { %v1200_v44 = vadd.f32 %v1183_v38, %v1171_v40  ;;  %v1204_v46 = vadd.f32 %v1183_v38, %v1175_v41  ;;  %v1202_v47 = vadd.f32 %v1191_v39, %v1173_v28  ;;  %v1206_v48 = vadd.f32 %v1191_v39, %v1177_v56  ;;  %v4865_v10 = vld [vmem:[#allocation7 + $0x3c8] ss:$16 sps:$4 sm:$0xff]   ;;  %v4870_v32 = vld [vmem:[#allocation7 + $0x1ac] ss:$16 sps:$4 sm:$0xff]  }
 0x1f2   : > { %v1209_v50 = vpack.c.bf16 %v1205_v58, %v1201_v42  ;;  %v1211_v51 = vpack.c.bf16 %v1207_v4, %v1203_v43  ;;  %v4873_v37 = vld [vmem:[#allocation7 + $0x3ac] ss:$16 sps:$4 sm:$0xff]   ;;  %v4868_v36 = vld [vmem:[#allocation7 + $0x1a8] ss:$16 sps:$4 sm:$0xff]  }
 0x1f3   : > { %v5737_v57 = vpack.c.bf16 %v1204_v46, %v1200_v44  ;;  %v5739_v52 = vpack.c.bf16 %v1206_v48, %v1202_v47  ;;  %v4871_v38 = vld [vmem:[#allocation7 + $0x3a8] ss:$16 sps:$4 sm:$0xff]   ;;  %v4876_v39 = vld [vmem:[#allocation7 + $0x18c] ss:$16 sps:$4 sm:$0xff]  }
 0x1f4   : > { %2039 = vmatprep.mubr.bf16.mxu0 %v1209_v50  ;;  %2082 = vmatprep.mubr.bf16.mxu1 %v1211_v51  ;;  %v4879_v40 = vld [vmem:[#allocation7 + $0x38c] ss:$16 sps:$4 sm:$0xff]   ;;  %v4874_v41 = vld [vmem:[#allocation7 + $0x188] ss:$16 sps:$4 sm:$0xff]  }
 0x1f5   : > { %2040 = vmatmul.mubr.bf16.vlgmr.msra.gmra.mxu0 %v5737_v57  ;;  %2083 = vmatmul.mubr.bf16.vlgmr.msra.gmra.mxu1 %v5739_v52  ;;  %v4877_v28 = vld [vmem:[#allocation7 + $0x388] ss:$16 sps:$4 sm:$0xff]   ;;  %v4882_v56 = vld [vmem:[#allocation7 + $0x16c] ss:$16 sps:$4 sm:$0xff]  }
 0x1f6   : > { %2094 = vmatpush1.bf16.msra.mxu0 %v4808_v54  ;;  %2137 = vmatpush1.bf16.msra.mxu1 %v4811_v55  ;;  %v4885_v42 = vld [vmem:[#allocation7 + $0x36c] ss:$16 sps:$4 sm:$0xff]   ;;  %v4880_v58 = vld [vmem:[#allocation7 + $0x168] ss:$16 sps:$4 sm:$0xff]  }
 0x1f7   : > { %2125 = vmatprep.mubr.bf16.mxu0 %v1209_v50  ;;  %2168 = vmatprep.mubr.bf16.mxu1 %v1211_v51  ;;  %v4883_v43 = vld [vmem:[#allocation7 + $0x368] ss:$16 sps:$4 sm:$0xff]   ;;  %v4888_v4 = vld [vmem:[#allocation7 + $0x14c] ss:$16 sps:$4 sm:$0xff]  }
 0x1f8   : > { %2095 = vmatprep.subr.bf16.mxu0 %v4816_v53  ;;  %2138 = vmatprep.subr.bf16.mxu1 %v4819_v24  ;;  %v4891_v44 = vld [vmem:[#allocation7 + $0x34c] ss:$16 sps:$4 sm:$0xff]   ;;  %v4886_v46 = vld [vmem:[#allocation7 + $0x148] ss:$16 sps:$4 sm:$0xff]  }
 0x1f9   : > { %v4889_v47 = vld [vmem:[#allocation7 + $0x348] ss:$16 sps:$4 sm:$0xff]   ;;  %v4894_v48 = vld [vmem:[#allocation7 + $0x12c] ss:$16 sps:$4 sm:$0xff]  }
 0x1fa   : > { %2096 = vmatpush1.bf16.msra.mxu0 %v4814_v25  ;;  %2139 = vmatpush1.bf16.msra.mxu1 %v4817_v59  ;;  %v4897_v50 = vld [vmem:[#allocation7 + $0x32c] ss:$16 sps:$4 sm:$0xff]   ;;  %v4892_v51 = vld [vmem:[#allocation7 + $0x128] ss:$16 sps:$4 sm:$0xff]   ;;  %v4906_v59 = vld [vmem:[#allocation8 + $0xe4] ss:$16 sps:$4 sm:$0xff]  }
 0x1fb   : > { %2097 = vmatprep.subr.bf16.mxu0 %v4822_v60  ;;  %2140 = vmatprep.subr.bf16.mxu1 %v4825_v61  ;;  %v4895_v54 = vld [vmem:[#allocation7 + $0x328] ss:$16 sps:$4 sm:$0xff]   ;;  %v4900_v55 = vld [vmem:[#allocation7 + $0x10c] ss:$16 sps:$4 sm:$0xff]   ;;  %v4909_v60 = vld [vmem:[#allocation8 + $0x2e4] ss:$16 sps:$4 sm:$0xff]  }
 0x1fc   : > { %v4903_v53 = vld [vmem:[#allocation7 + $0x30c] ss:$16 sps:$4 sm:$0xff]   ;;  %v4898_v24 = vld [vmem:[#allocation7 + $0x108] ss:$16 sps:$4 sm:$0xff]   ;;  %v4904_v61 = vld [vmem:[#allocation8 + $0xe0] ss:$16 sps:$4 sm:$0xff]  }
 0x1fd   : > { %v4901_v25 = vld [vmem:[#allocation7 + $0x308] ss:$16 sps:$4 sm:$0xff]  }
 0x1fe   : > { %2098 = vmatpush1.bf16.msra.mxu0 %v4820_v62  ;;  %2141 = vmatpush1.bf16.msra.mxu1 %v4823_v63  ;;  %v4907_v62 = vld [vmem:[#allocation8 + $0x2e0] ss:$16 sps:$4 sm:$0xff]   ;;  %v4912_v63 = vld [vmem:[#allocation8 + $0xc4] ss:$16 sps:$4 sm:$0xff]  }
 0x1ff   : > { %2099 = vmatprep.subr.bf16.mxu0 %v4828_v2  ;;  %2142 = vmatprep.subr.bf16.mxu1 %v4831_v3  ;;  %v4915_v2 = vld [vmem:[#allocation8 + $0x2c4] ss:$16 sps:$4 sm:$0xff]   ;;  %v4910_v3 = vld [vmem:[#allocation8 + $0xc0] ss:$16 sps:$4 sm:$0xff]  }
 0x202   : > { %2100 = vmatpush1.bf16.msra.mxu0 %v4826_v6  ;;  %2143 = vmatpush1.bf16.msra.mxu1 %v4829_v7  ;;  %v4913_v6 = vld [vmem:[#allocation8 + $0x2c0] ss:$16 sps:$4 sm:$0xff]   ;;  %v4918_v7 = vld [vmem:[#allocation8 + $0xa4] ss:$16 sps:$4 sm:$0xff]  }
 0x203   : > { %2101 = vmatprep.subr.bf16.mxu0 %v4834_v8  ;;  %2144 = vmatprep.subr.bf16.mxu1 %v4837_v9  ;;  %v4916_v8 = vld [vmem:[#allocation8 + $0xa0] ss:$16 sps:$4 sm:$0xff]   ;;  %v4924_v9 = vld [vmem:[#allocation8 + $0x84] ss:$16 sps:$4 sm:$0xff]  }
 0x206   : > { %2102 = vmatpush1.bf16.msra.mxu0 %v4832_v11  ;;  %2145 = vmatpush1.bf16.msra.mxu1 %v4835_v12  ;;  %v4927_v11 = vld [vmem:[#allocation8 + $0x284] ss:$16 sps:$4 sm:$0xff]   ;;  %v4922_v12 = vld [vmem:[#allocation8 + $0x80] ss:$16 sps:$4 sm:$0xff]  }
 0x207   : > { %2103 = vmatprep.subr.bf16.mxu0 %v4840_v13  ;;  %2146 = vmatprep.subr.bf16.mxu1 %v4843_v14  ;;  %v4925_v13 = vld [vmem:[#allocation8 + $0x280] ss:$16 sps:$4 sm:$0xff]   ;;  %v4930_v14 = vld [vmem:[#allocation8 + $0x64] ss:$16 sps:$4 sm:$0xff]  }
 0x20a   : > { %2104 = vmatpush1.bf16.msra.mxu0 %v4838_v15  ;;  %2147 = vmatpush1.bf16.msra.mxu1 %v4841_v16  ;;  %v4933_v15 = vld [vmem:[#allocation8 + $0x264] ss:$16 sps:$4 sm:$0xff]   ;;  %v4928_v16 = vld [vmem:[#allocation8 + $0x60] ss:$16 sps:$4 sm:$0xff]  }
 0x20b   : > { %2105 = vmatprep.subr.bf16.mxu0 %v4846_v30  ;;  %2148 = vmatprep.subr.bf16.mxu1 %v4849_v17  ;;  %v4931_v30 = vld [vmem:[#allocation8 + $0x260] ss:$16 sps:$4 sm:$0xff]   ;;  %v4936_v17 = vld [vmem:[#allocation8 + $0x44] ss:$16 sps:$4 sm:$0xff]  }
 0x20e   : > { %2106 = vmatpush1.bf16.msra.mxu0 %v4844_v18  ;;  %2149 = vmatpush1.bf16.msra.mxu1 %v4847_v20  ;;  %v4939_v18 = vld [vmem:[#allocation8 + $0x244] ss:$16 sps:$4 sm:$0xff]   ;;  %v4934_v20 = vld [vmem:[#allocation8 + $0x40] ss:$16 sps:$4 sm:$0xff]  }
 0x20f   : > { %2107 = vmatprep.subr.bf16.mxu0 %v4852_v21  ;;  %2150 = vmatprep.subr.bf16.mxu1 %v4855_v22  ;;  %v4937_v21 = vld [vmem:[#allocation8 + $0x240] ss:$16 sps:$4 sm:$0xff]   ;;  %v4942_v22 = vld [vmem:[#allocation8 + $0x24] ss:$16 sps:$4 sm:$0xff]  }
 0x212   : > { %2108 = vmatpush1.bf16.msra.mxu0 %v4850_v23  ;;  %2151 = vmatpush1.bf16.msra.mxu1 %v4853_v26  ;;  %v4945_v23 = vld [vmem:[#allocation8 + $0x224] ss:$16 sps:$4 sm:$0xff]   ;;  %v4940_v26 = vld [vmem:[#allocation8 + $0x20] ss:$16 sps:$4 sm:$0xff]  }
 0x213   : > { %2109 = vmatprep.subr.bf16.mxu0 %v4858_v27  ;;  %2152 = vmatprep.subr.bf16.mxu1 %v4861_v29  ;;  %v4943_v27 = vld [vmem:[#allocation8 + $0x220] ss:$16 sps:$4 sm:$0xff]   ;;  %v4948_v29 = vld [vmem:[#allocation8 + $0x4] ss:$16 sps:$4 sm:$0xff]  }
 0x216   : > { %2110 = vmatpush2.bf16.msra.mxu0 %v4856_v0  ;;  %2153 = vmatpush2.bf16.msra.mxu1 %v4859_v34  ;;  %v4951_v0 = vld [vmem:[#allocation8 + $0x204] ss:$16 sps:$4 sm:$0xff]   ;;  %v4946_v34 = vld [vmem:[#allocation8] ss:$16 sps:$4 sm:$0xff]  }
 0x217   : > { %2111 = vmatprep.subr.bf16.mxu0 %v4864_v19  ;;  %2154 = vmatprep.subr.bf16.mxu1 %v4867_v35  ;;  %v4949_v19 = vld [vmem:[#allocation8 + $0x200] ss:$16 sps:$4 sm:$0xff]   ;;  %v4954_v35 = vld [vmem:[#allocation8 + $0x1e4] ss:$16 sps:$4 sm:$0xff]  }
 0x21a   : > { %2112 = vmatpush2.bf16.msra.mxu0 %v4862_v5  ;;  %2155 = vmatpush2.bf16.msra.mxu1 %v4865_v10  ;;  %v4957_v5 = vld [vmem:[#allocation8 + $0x3e4] ss:$16 sps:$4 sm:$0xff]   ;;  %v4952_v10 = vld [vmem:[#allocation8 + $0x1e0] ss:$16 sps:$4 sm:$0xff]  }
 0x21b   : > { %2113 = vmatprep.subr.bf16.mxu0 %v4870_v32  ;;  %2156 = vmatprep.subr.bf16.mxu1 %v4873_v37  ;;  %v4955_v32 = vld [vmem:[#allocation8 + $0x3e0] ss:$16 sps:$4 sm:$0xff]   ;;  %v4960_v37 = vld [vmem:[#allocation8 + $0x1c4] ss:$16 sps:$4 sm:$0xff]  }
 0x21e   : > { %2114 = vmatpush2.bf16.msra.mxu0 %v4868_v36  ;;  %2157 = vmatpush2.bf16.msra.mxu1 %v4871_v38  ;;  %v4963_v36 = vld [vmem:[#allocation8 + $0x3c4] ss:$16 sps:$4 sm:$0xff]   ;;  %v4958_v38 = vld [vmem:[#allocation8 + $0x1c0] ss:$16 sps:$4 sm:$0xff]  }
 0x21f   : > { %2115 = vmatprep.subr.bf16.mxu0 %v4876_v39  ;;  %2158 = vmatprep.subr.bf16.mxu1 %v4879_v40  ;;  %v4961_v39 = vld [vmem:[#allocation8 + $0x3c0] ss:$16 sps:$4 sm:$0xff]   ;;  %v4966_v40 = vld [vmem:[#allocation8 + $0x1a4] ss:$16 sps:$4 sm:$0xff]  }
 0x222   : > { %2116 = vmatpush2.bf16.msra.mxu0 %v4874_v41  ;;  %2159 = vmatpush2.bf16.msra.mxu1 %v4877_v28  ;;  %v4969_v41 = vld [vmem:[#allocation8 + $0x3a4] ss:$16 sps:$4 sm:$0xff]  }
 0x223   : > { %2117 = vmatprep.subr.bf16.mxu0 %v4882_v56  ;;  %2160 = vmatprep.subr.bf16.mxu1 %v4885_v42  ;;  %v4964_v56 = vld [vmem:[#allocation8 + $0x1a0] ss:$16 sps:$4 sm:$0xff]  }
 0x224   : > { %v4967_v42 = vld [vmem:[#allocation8 + $0x3a0] ss:$16 sps:$4 sm:$0xff]  }
 0x226   : > { %2118 = vmatpush2.bf16.msra.mxu0 %v4880_v58  ;;  %2161 = vmatpush2.bf16.msra.mxu1 %v4883_v43  ;;  %v4972_v58 = vld [vmem:[#allocation8 + $0x184] ss:$16 sps:$4 sm:$0xff]  }
 0x227   : > { %2119 = vmatprep.subr.bf16.mxu0 %v4888_v4  ;;  %2162 = vmatprep.subr.bf16.mxu1 %v4891_v44  ;;  %v4975_v43 = vld [vmem:[#allocation8 + $0x384] ss:$16 sps:$4 sm:$0xff]   ;;  %v4970_v44 = vld [vmem:[#allocation8 + $0x180] ss:$16 sps:$4 sm:$0xff]  }
 0x22a   : > { %2120 = vmatpush2.bf16.msra.mxu0 %v4886_v46  ;;  %2163 = vmatpush2.bf16.msra.mxu1 %v4889_v47  ;;  %v4973_v46 = vld [vmem:[#allocation8 + $0x380] ss:$16 sps:$4 sm:$0xff]  }
 0x22b   : > { %2121 = vmatprep.subr.bf16.mxu0 %v4894_v48  ;;  %2164 = vmatprep.subr.bf16.mxu1 %v4897_v50  ;;  %v4978_v48 = vld [vmem:[#allocation8 + $0x164] ss:$16 sps:$4 sm:$0xff]  }
 0x22c   : > { %v4981_v50 = vld [vmem:[#allocation8 + $0x364] ss:$16 sps:$4 sm:$0xff]  }
 0x22e   : > { %2122 = vmatpush2.bf16.msra.mxu0 %v4892_v51  ;;  %2165 = vmatpush2.bf16.msra.mxu1 %v4895_v54  ;;  %v4976_v54 = vld [vmem:[#allocation8 + $0x160] ss:$16 sps:$4 sm:$0xff]  }
 0x22f   : > { %2123 = vmatprep.subr.bf16.mxu0 %v4900_v55  ;;  %2166 = vmatprep.subr.bf16.mxu1 %v4903_v53  ;;  %v4979_v55 = vld [vmem:[#allocation8 + $0x360] ss:$16 sps:$4 sm:$0xff]  }
 0x232   : > { %2124 = vmatpush2.bf16.msra.mxu0 %v4898_v24  ;;  %2167 = vmatpush2.bf16.msra.mxu1 %v4901_v25  ;;  %v4982_v24 = vld [vmem:[#allocation8 + $0x140] ss:$16 sps:$4 sm:$0xff]   ;;  %v4984_v25 = vld [vmem:[#allocation8 + $0x144] ss:$16 sps:$4 sm:$0xff]  }
 0x233   : > { %3196 = vmatprep.subr.bf16.mxu0 %v4906_v59  ;;  %3239 = vmatprep.subr.bf16.mxu1 %v4909_v60  ;;  %v4985_v59 = vld [vmem:[#allocation8 + $0x340] ss:$16 sps:$4 sm:$0xff]   ;;  %v4987_v60 = vld [vmem:[#allocation8 + $0x344] ss:$16 sps:$4 sm:$0xff]  }
 0x235   : > { %2126 = vmatmul.mubr.bf16.vlgmr.msra.gmra.mxu0 %v5737_v57  ;;  %2169 = vmatmul.mubr.bf16.vlgmr.msra.gmra.mxu1 %v5739_v52  ;;  %v4921_v57 = vld [vmem:[#allocation8 + $0x2a4] ss:$16 sps:$4 sm:$0xff]   ;;  %v4919_v52 = vld [vmem:[#allocation8 + $0x2a0] ss:$16 sps:$4 sm:$0xff]  }
 0x236   : > { %3197 = vmatpush1.bf16.msra.mxu0 %v4904_v61  ;;  %3240 = vmatpush1.bf16.msra.mxu1 %v4907_v62  ;;  %v1213_v61 = vld [vmem:[#allocation11 + $0x3] ss:$8 sm:$0xf] }
 0x237   : > { %3198 = vmatprep.subr.bf16.mxu0 %v4912_v63  ;;  %3241 = vmatprep.subr.bf16.mxu1 %v4915_v2  ;;  %v4990_v63 = vld [vmem:[#allocation8 + $0x124] ss:$16 sps:$4 sm:$0xff]   ;;  %v1354_v2 = vrot.slane %v1213_v61, %v5653_v33 }
 0x23a   : > { %3199 = vmatpush1.bf16.msra.mxu0 %v4910_v3  ;;  %3242 = vmatpush1.bf16.msra.mxu1 %v4913_v6  ;;  %v4993_v3 = vld [vmem:[#allocation8 + $0x324] ss:$16 sps:$4 sm:$0xff]  }
 0x23b   : > { %3200 = vmatprep.subr.bf16.mxu0 %v4918_v7  ;;  %3243 = vmatprep.subr.bf16.mxu1 %v4921_v57  ;;  %v4988_v7 = vld [vmem:[#allocation8 + $0x120] ss:$16 sps:$4 sm:$0xff]  }
 0x23c   : > { %v4991_v57 = vld [vmem:[#allocation8 + $0x320] ss:$16 sps:$4 sm:$0xff]  }
 0x23e   : > { %3201 = vmatpush1.bf16.msra.mxu0 %v4916_v8  ;;  %3244 = vmatpush1.bf16.msra.mxu1 %v4919_v52  ;;  %v1350_v8 = vrot.slane %v1213_v61, %v5650_v31 }
 0x23f   : > { %3202 = vmatprep.subr.bf16.mxu0 %v4924_v9  ;;  %3245 = vmatprep.subr.bf16.mxu1 %v4927_v11  ;;  %v4996_v9 = vld [vmem:[#allocation8 + $0x104] ss:$16 sps:$4 sm:$0xff]  }
 0x240   : > { %v4999_v11 = vld [vmem:[#allocation8 + $0x304] ss:$16 sps:$4 sm:$0xff]  }
 0x242   : > { %3203 = vmatpush1.bf16.msra.mxu0 %v4922_v12  ;;  %3246 = vmatpush1.bf16.msra.mxu1 %v4925_v13 }
 0x243   : > { %3204 = vmatprep.subr.bf16.mxu0 %v4930_v14  ;;  %3247 = vmatprep.subr.bf16.mxu1 %v4933_v15  ;;  %v4994_v15 = vld [vmem:[#allocation8 + $0x100] ss:$16 sps:$4 sm:$0xff]  }
 0x246   : > { %3205 = vmatpush1.bf16.msra.mxu0 %v4928_v16  ;;  %3248 = vmatpush1.bf16.msra.mxu1 %v4931_v30 }
 0x247   : > { %3206 = vmatprep.subr.bf16.mxu0 %v4936_v17  ;;  %3249 = vmatprep.subr.bf16.mxu1 %v4939_v18  ;;  %v4997_v17 = vld [vmem:[#allocation8 + $0x300] ss:$16 sps:$4 sm:$0xff]  }
 0x24a   : > { %3207 = vmatpush1.bf16.msra.mxu0 %v4934_v20  ;;  %3250 = vmatpush1.bf16.msra.mxu1 %v4937_v21 }
 0x24b   : > { %3208 = vmatprep.subr.bf16.mxu0 %v4942_v22  ;;  %3251 = vmatprep.subr.bf16.mxu1 %v4945_v23  ;;  %v5002_v23 = vld [vmem:[#allocation8 + $0xec] ss:$16 sps:$4 sm:$0xff]  }
 0x24e   : > { %3209 = vmatpush1.bf16.msra.mxu0 %v4940_v26  ;;  %3252 = vmatpush1.bf16.msra.mxu1 %v4943_v27  ;;  %v5005_v26 = vld [vmem:[#allocation8 + $0x2ec] ss:$16 sps:$4 sm:$0xff]  }
 0x24f   : > { %3210 = vmatprep.subr.bf16.mxu0 %v4948_v29  ;;  %3253 = vmatprep.subr.bf16.mxu1 %v4951_v0 }
 0x252   : > { %3211 = vmatpush1.bf16.msra.mxu0 %v4946_v34  ;;  %3254 = vmatpush1.bf16.msra.mxu1 %v4949_v19 }
 0x253   : > { %3212 = vmatprep.subr.bf16.mxu0 %v4954_v35  ;;  %3255 = vmatprep.subr.bf16.mxu1 %v4957_v5 }
 0x256   : > { %3213 = vmatpush2.bf16.msra.mxu0 %v4952_v10  ;;  %3256 = vmatpush2.bf16.msra.mxu1 %v4955_v32 }
 0x257   : > { %3214 = vmatprep.subr.bf16.mxu0 %v4960_v37  ;;  %3257 = vmatprep.subr.bf16.mxu1 %v4963_v36 }
 0x25a   : > { %3215 = vmatpush2.bf16.msra.mxu0 %v4958_v38  ;;  %3258 = vmatpush2.bf16.msra.mxu1 %v4961_v39 }
 0x25b   : > { %3216 = vmatprep.subr.bf16.mxu0 %v4966_v40  ;;  %3259 = vmatprep.subr.bf16.mxu1 %v4969_v41 }
 0x25e   : > { %3217 = vmatpush2.bf16.msra.mxu0 %v4964_v56  ;;  %3260 = vmatpush2.bf16.msra.mxu1 %v4967_v42  ;;  %v1358_v42 = vrot.slane %v1213_v61, %v5658_v45 }
 0x25f   : > { %3218 = vmatprep.subr.bf16.mxu0 %v4972_v58  ;;  %3261 = vmatprep.subr.bf16.mxu1 %v4975_v43  ;;  %v1362_v43 = vrot.slane %v1213_v61, %v5661_v49 }
 0x262   : > { %3219 = vmatpush2.bf16.msra.mxu0 %v4970_v44  ;;  %3262 = vmatpush2.bf16.msra.mxu1 %v4973_v46 }
 0x263   : > { %3220 = vmatprep.subr.bf16.mxu0 %v4978_v48  ;;  %3263 = vmatprep.subr.bf16.mxu1 %v4981_v50 }
 0x266   : > { %3221 = vmatpush2.bf16.msra.mxu0 %v4976_v54  ;;  %3264 = vmatpush2.bf16.msra.mxu1 %v4979_v55 }
 0x267   : > { %3222 = vmatprep.subr.bf16.mxu0 %v4984_v25  ;;  %3265 = vmatprep.subr.bf16.mxu1 %v4987_v60 }
 0x26a   : > { %3223 = vmatpush2.bf16.msra.mxu0 %v4982_v24  ;;  %3266 = vmatpush2.bf16.msra.mxu1 %v4985_v59 }
 0x26b   : > { %3224 = vmatprep.subr.bf16.mxu0 %v4990_v63  ;;  %3267 = vmatprep.subr.bf16.mxu1 %v4993_v3 }
 0x26e   : > { %3225 = vmatpush2.bf16.msra.mxu0 %v4988_v7  ;;  %3268 = vmatpush2.bf16.msra.mxu1 %v4991_v57 }
 0x26f   : > { %3226 = vmatprep.subr.bf16.mxu0 %v4996_v9  ;;  %3269 = vmatprep.subr.bf16.mxu1 %v4999_v11 }
 0x272   : > { %3227 = vmatpush2.bf16.msra.mxu0 %v4994_v15  ;;  %3270 = vmatpush2.bf16.msra.mxu1 %v4997_v17 }
 0x273   : > { %3282 = vmatprep.subr.bf16.mxu0 %v5002_v23  ;;  %3325 = vmatprep.subr.bf16.mxu1 %v5005_v26 }
 0x2b5   : > { %v2041_v28 = vpop.f32.mrf.mxu0  ;;  %v2084_v47 = vpop.f32.mrf.mxu1 }
 0x2b6   : > { %v2042_v16 = vadd.f32 %v2041_v28, %v1350_v8 }
 0x2b7   : > { %v2043_v4 = vpop.f32.mrf.mxu0  ;;  %v2086_v53 = vpop.f32.mrf.mxu1 }
 0x2b8   : > { %v2044_v12 = vadd.f32 %v2043_v4, %v1354_v2  ;;  %v2085_v21 = vadd.f32 %v2084_v47, %v2042_v16 }
 0x2b9   : > { %v2045_v51 = vpop.f32.mrf.mxu0  ;;  %v2088_v6 = vpop.f32.mrf.mxu1 }
 0x2ba   : > { %v2046_v13 = vadd.f32 %v2045_v51, %v1350_v8  ;;  %v2087_v18 = vadd.f32 %v2086_v53, %v2044_v12  ;;  %v5753_v0 = vmax.f32 %v2085_v21, 0.0 }
 0x2bb   : > { %v2047_v62 = vpop.f32.mrf.mxu0  ;;  %v2090_v14 = vpop.f32.mrf.mxu1 }
 0x2bc   : > { %v2048_v52 = vadd.f32 %v2047_v62, %v1354_v2  ;;  %v2089_v20 = vadd.f32 %v2088_v6, %v2046_v13  ;;  %v5749_v27 = vmax.f32 %v2087_v18, 0.0 }
 0x2be   : > { %v2091_v30 = vadd.f32 %v2090_v14, %v2048_v52  ;;  %v5751_v29 = vmax.f32 %v2089_v20, 0.0 }
 0x2c0   : > { %v5747_v22 = vmax.f32 %v2091_v30, 0.0  ;;  %v2187_v19 = vadd.f32 %v5751_v29, %v5753_v0 }
 0x2c2   : > { %v2194_v34 = vadd.f32 %v5747_v22, %v5749_v27  ;;  %v2188_v5 = vrot.slane %v2187_v19, 4 }
 0x2c4   : > { %v2195_v35 = vrot.slane %v2194_v34, 4  ;;  %v2189_v32 = vadd.f32 %v2188_v5, %v2187_v19 }
 0x2c6   : > { %v2196_v10 = vadd.f32 %v2195_v35, %v2194_v34  ;;  %v2190_v36 = vrot.slane %v2189_v32, 2 }
 0x2c8   : > { %v2197_v37 = vrot.slane %v2196_v10, 2  ;;  %v2191_v39 = vadd.f32 %v2190_v36, %v2189_v32 }
 0x2ca   : > { %v2198_v38 = vadd.f32 %v2197_v37, %v2196_v10  ;;  %v2192_v41 = vrot.slane %v2191_v39, 1 }
 0x2cc   : > { %v2199_v40 = vrot.slane %v2198_v38, 1  ;;  %v2193_v56 = vadd.f32 %v2192_v41, %v2191_v39 }
 0x2ce   : > { %v2200_v28 = vadd.f32 %v2199_v40, %v2198_v38  ;;  %v5763_v4 = vmul.f32 0.0625, %v2193_v56 }
 0x2d0   : > { %v5760_v58 = vmul.f32 0.0625, %v2200_v28  ;;  %v2219_v53 = vsub.f32 %v5753_v0, %v5763_v4  ;;  %v2223_v24 = vsub.f32 %v5751_v29, %v5763_v4 }
 0x2d2   : > { %v2220_v48 = vsub.f32 %v5749_v27, %v5760_v58  ;;  %v2224_v54 = vsub.f32 %v5747_v22, %v5760_v58  ;;  %v2227_v57 = vmul.f32 %v2219_v53, %v2219_v53  ;;  %v2231_v8 = vmul.f32 %v2223_v24, %v2223_v24 }
 0x2d4   : > { %v2228_v62 = vmul.f32 %v2220_v48, %v2220_v48  ;;  %v2232_v2 = vmul.f32 %v2224_v54, %v2224_v54  ;;  %v2235_v30 = vadd.f32 %v2231_v8, %v2227_v57 }
 0x2d6   : > { %v2242_v13 = vadd.f32 %v2232_v2, %v2228_v62  ;;  %v2236_v26 = vrot.slane %v2235_v30, 4 }
 0x2d8   : > { %v2243_v20 = vrot.slane %v2242_v13, 4  ;;  %v2237_v32 = vadd.f32 %v2236_v26, %v2235_v30 }
 0x2da   : > { %v2244_v35 = vadd.f32 %v2243_v20, %v2242_v13  ;;  %v2238_v41 = vrot.slane %v2237_v32, 2 }
 0x2dc   : > { %v2245_v38 = vrot.slane %v2244_v35, 2 }
 0x2f5   : > { %v2127_v44 = vpop.f32.mrf.mxu0  ;;  %v2170_v46 = vpop.f32.mrf.mxu1 }
 0x2f6   : > { %v2128_v47 = vadd.f32 %v2127_v44, %v1358_v42 }
 0x2f7   : > { %v2129_v50 = vpop.f32.mrf.mxu0  ;;  %v2172_v51 = vpop.f32.mrf.mxu1 }
 0x2f8   : > { %v2130_v55 = vadd.f32 %v2129_v50, %v1362_v43  ;;  %v2171_v60 = vadd.f32 %v2170_v46, %v2128_v47  ;;  %v2239_v47 = vadd.f32 %v2238_v41, %v2237_v32  ;;  %v1215_v41 = vld [vmem:[#allocation11 + $0x4] ss:$8 sm:$0xf] }
 0x2f9   : > { %v2131_v25 = vpop.f32.mrf.mxu0  ;;  %v2174_v59 = vpop.f32.mrf.mxu1 }
 0x2fa   : > { %v2132_v61 = vadd.f32 %v2131_v25, %v1358_v42  ;;  %v2173_v3 = vadd.f32 %v2172_v51, %v2130_v55  ;;  %v5773_v9 = vmax.f32 %v2171_v60, 0.0  ;;  %v2246_v42 = vadd.f32 %v2245_v38, %v2244_v35 }
 0x2fb   : > { %v2133_v63 = vpop.f32.mrf.mxu0  ;;  %v2176_v52 = vpop.f32.mrf.mxu1 }
 0x2fc   : > { %v2175_v6 = vadd.f32 %v2174_v59, %v2132_v61  ;;  %v2134_v7 = vadd.f32 %v2133_v63, %v1362_v43  ;;  %v5777_v14 = vmax.f32 %v2173_v3, 0.0  ;;  %v2247_v55 = vrot.slane %v2246_v42, 1 }
 0x2fd   : > { %v2240_v59 = vrot.slane %v2239_v47, 1 }
 0x2fe   : > { %v5775_v11 = vmax.f32 %v2175_v6, 0.0  ;;  %v2177_v12 = vadd.f32 %v2176_v52, %v2134_v7  ;;  %v2248_v62 = vadd.f32 %v2247_v55, %v2246_v42 }
 0x2ff   : > { %v2241_v3 = vadd.f32 %v2240_v59, %v2239_v47 }
 0x300   : > { %v2201_v15 = vadd.f32 %v5775_v11, %v5773_v9  ;;  %v5781_v16 = vmax.f32 %v2177_v12, 0.0  ;;  %v2264_v57 = vmul.f32 0.0625, %v2248_v62 }
 0x301   : > { %v2263_v12 = vmul.f32 0.0625, %v2241_v3 }
 0x302   : > { %v2202_v17 = vrot.slane %v2201_v15, 4  ;;  %v2208_v18 = vadd.f32 %v5781_v16, %v5777_v14  ;;  %v2268_v30 = vadd.f32 1e-05, %v2264_v57 }
 0x303   : > { %v2267_v20 = vadd.f32 1e-05, %v2263_v12 }
 0x304   : > { %v2203_v21 = vadd.f32 %v2202_v17, %v2201_v15  ;;  %v2209_v23 = vrot.slane %v2208_v18, 4  ;;  %5136 = vrsqrt.f32 %v2268_v30 }
 0x305   : > { %5138 = vrsqrt.f32 %v2267_v20 }
 0x306   : > { %v2204_v34 = vrot.slane %v2203_v21, 2  ;;  %v2210_v19 = vadd.f32 %v2209_v23, %v2208_v18 }
 0x308   : > { %v2205_v5 = vadd.f32 %v2204_v34, %v2203_v21  ;;  %v2211_v10 = vrot.slane %v2210_v19, 2 }
 0x30a   : > { %v2206_v37 = vrot.slane %v2205_v5, 1  ;;  %v2212_v36 = vadd.f32 %v2211_v10, %v2210_v19 }
 0x30c   : > { %v2207_v39 = vadd.f32 %v2206_v37, %v2205_v5  ;;  %v2213_v40 = vrot.slane %v2212_v36, 1 }
 0x30e   : > { %v2217_v28 = vmul.f32 0.0625, %v2207_v39  ;;  %v2214_v56 = vadd.f32 %v2213_v40, %v2212_v36 }
 0x310   : > { %v2221_v43 = vsub.f32 %v5773_v9, %v2217_v28  ;;  %v2225_v44 = vsub.f32 %v5775_v11, %v2217_v28  ;;  %v2218_v46 = vmul.f32 0.0625, %v2214_v56 }
 0x311   : > { %v5137_v35 = vpop.eup %5136 }
 0x312   : > { %v2229_v48 = vmul.f32 %v2221_v43, %v2221_v43  ;;  %v2233_v50 = vmul.f32 %v2225_v44, %v2225_v44  ;;  %v2222_v51 = vsub.f32 %v5777_v14, %v2218_v46  ;;  %v2226_v54 = vsub.f32 %v5781_v16, %v2218_v46  ;;  %v5139_v5 = vpop.eup %5138 }
 0x313   : > { %v2279_v32 = vcombine.low %v5139_v5, %v5137_v35  ;;  %v5017_v35 = vld [vmem:[#allocation8 + $0x2ac] ss:$16 sps:$4 sm:$0xff]   ;;  %v5012_v5 = vld [vmem:[#allocation8 + $0xa8] ss:$16 sps:$4 sm:$0xff]  }
 0x314   : > { %v2249_v53 = vadd.f32 %v2233_v50, %v2229_v48  ;;  %v2230_v24 = vmul.f32 %v2222_v51, %v2222_v51  ;;  %v2234_v25 = vmul.f32 %v2226_v54, %v2226_v54 }
 0x315   : > { %v2287_v38 = vrot.slane %v2279_v32, %v5710_v1  ;;  %v5020_v32 = vld [vmem:[#allocation8 + $0x8c] ss:$16 sps:$4 sm:$0xff]  }
 0x316   : > { %v2250_v60 = vrot.slane %v2249_v53, 4  ;;  %v2256_v61 = vadd.f32 %v2234_v25, %v2230_v24 }
 0x318   : > { %v2251_v63 = vadd.f32 %v2250_v60, %v2249_v53  ;;  %v2257_v2 = vrot.slane %v2256_v61, 4 }
 0x31a   : > { %v2252_v6 = vrot.slane %v2251_v63, 2  ;;  %v2258_v7 = vadd.f32 %v2257_v2, %v2256_v61  ;;  %v1217_v61 = vld [vmem:[#allocation11 + $0x5] ss:$8 sm:$0xf] }
 0x31c   : > { %v2253_v8 = vadd.f32 %v2252_v6, %v2251_v63  ;;  %v2259_v52 = vrot.slane %v2258_v7, 2 }
 0x31e   : > { %v2254_v13 = vrot.slane %v2253_v8, 1  ;;  %v2260_v15 = vadd.f32 %v2259_v52, %v2258_v7 }
 0x320   : > { %v2255_v17 = vadd.f32 %v2254_v13, %v2253_v8  ;;  %v2261_v18 = vrot.slane %v2260_v15, 1 }
 0x322   : > { %v2265_v21 = vmul.f32 0.0625, %v2255_v17  ;;  %v2262_v23 = vadd.f32 %v2261_v18, %v2260_v15 }
 0x324   : > { %v2269_v26 = vadd.f32 1e-05, %v2265_v21  ;;  %v2266_v34 = vmul.f32 0.0625, %v2262_v23  ;;  %v5000_v21 = vld [vmem:[#allocation8 + $0xe8] ss:$16 sps:$4 sm:$0xff]  }
 0x325   : > { %v5003_v23 = vld [vmem:[#allocation8 + $0x2e8] ss:$16 sps:$4 sm:$0xff]  }
 0x326   : > { %v2270_v19 = vadd.f32 1e-05, %v2266_v34  ;;  %5140 = vrsqrt.f32 %v2269_v26  ;;  %v5009_v34 = vld [vmem:[#allocation8 + $0x2c8] ss:$16 sps:$4 sm:$0xff]  }
 0x328   : > { %5142 = vrsqrt.f32 %v2270_v19  ;;  %v5014_v19 = vld [vmem:[#allocation8 + $0xac] ss:$16 sps:$4 sm:$0xff]  }
 0x333   : > { %v5141_v10 = vpop.eup %5140 }
 0x335   : > { %v5143_v37 = vpop.eup %5142 }
 0x336   : > { %v2280_v36 = vcombine.low %v5141_v10, %v5143_v37  ;;  %v5015_v10 = vld [vmem:[#allocation8 + $0x2a8] ss:$16 sps:$4 sm:$0xff]   ;;  %v5023_v37 = vld [vmem:[#allocation8 + $0x28c] ss:$16 sps:$4 sm:$0xff]  }
 0x338   : > { %v2294_v39 = vrot.slane %v2280_v36, %v5710_v1  ;;  %v5018_v36 = vld [vmem:[#allocation8 + $0x88] ss:$16 sps:$4 sm:$0xff]  }
 0x33a   : > { %v2295_v40 = vcombine.low %v2287_v38, %v2294_v39  ;;  %v5021_v38 = vld [vmem:[#allocation8 + $0x288] ss:$16 sps:$4 sm:$0xff]   ;;  %v5026_v39 = vld [vmem:[#allocation8 + $0x6c] ss:$16 sps:$4 sm:$0xff]  }
 0x33c   : > { %v2302_v56 = vrot.slane %v2295_v40, %v5710_v1  ;;  %v5029_v40 = vld [vmem:[#allocation8 + $0x26c] ss:$16 sps:$4 sm:$0xff]  }
 0x33e   : > { %v2304_v42 = vmul.f32 %v2302_v56, %v1215_v41  ;;  %v5024_v41 = vld [vmem:[#allocation8 + $0x68] ss:$16 sps:$4 sm:$0xff]  }
 0x33f   : > { %v5027_v56 = vld [vmem:[#allocation8 + $0x268] ss:$16 sps:$4 sm:$0xff]  }
 0x340   : > { %v2317_v43 = vrot.slane %v2304_v42, %v5658_v45  ;;  %v2321_v44 = vrot.slane %v2304_v42, %v5661_v49  ;;  %v2309_v47 = vrot.slane %v2304_v42, %v5650_v31  ;;  %v2313_v48 = vrot.slane %v2304_v42, %v5653_v33  ;;  %v5032_v42 = vld [vmem:[#allocation8 + $0x4c] ss:$16 sps:$4 sm:$0xff]  }
 0x342   : > { %v2328_v50 = vmul.f32 %v2317_v43, %v2217_v28  ;;  %v2329_v51 = vmul.f32 %v2321_v44, %v2218_v46  ;;  %v2326_v54 = vmul.f32 %v2309_v47, %v5763_v4  ;;  %v2327_v55 = vmul.f32 %v2313_v48, %v5760_v58 }
 0x343   : > { %v2367_v2 = vmul.f32 %v2321_v44, %v5781_v16  ;;  %v2361_v28 = vmul.f32 %v2313_v48, %v5749_v27  ;;  %v2365_v46 = vmul.f32 %v2313_v48, %v5747_v22  ;;  %v2363_v4 = vmul.f32 %v2321_v44, %v5777_v14  ;;  %v5030_v44 = vld [vmem:[#allocation8 + $0x48] ss:$16 sps:$4 sm:$0xff]   ;;  %v5038_v48 = vld [vmem:[#allocation8 + $0x2c] ss:$16 sps:$4 sm:$0xff]  }
 0x344   : > { %v2335_v53 = vcombine.low %v2328_v50, %v2329_v51  ;;  %v2334_v24 = vcombine.low %v2326_v54, %v2327_v55  ;;  %v2360_v57 = vmul.f32 %v2309_v47, %v5753_v0  ;;  %v2364_v8 = vmul.f32 %v2309_v47, %v5751_v29  ;;  %v5008_v29 = vld [vmem:[#allocation8 + $0xcc] ss:$16 sps:$4 sm:$0xff]   ;;  %v5033_v47 = vld [vmem:[#allocation8 + $0x248] ss:$16 sps:$4 sm:$0xff]  }
 0x345   : > { %v2362_v16 = vmul.f32 %v2317_v43, %v5773_v9  ;;  %v2366_v27 = vmul.f32 %v2317_v43, %v5775_v11  ;;  %v5011_v9 = vld [vmem:[#allocation8 + $0x2cc] ss:$16 sps:$4 sm:$0xff]   ;;  %v5006_v11 = vld [vmem:[#allocation8 + $0xc8] ss:$16 sps:$4 sm:$0xff]  }
 0x346   : > { %v2349_v25 = vrot.slane %v2335_v53, %v5710_v1  ;;  %v2342_v59 = vrot.slane %v2334_v24, %v5710_v1  ;;  %v5035_v43 = vld [vmem:[#allocation8 + $0x24c] ss:$16 sps:$4 sm:$0xff]   ;;  %v5036_v51 = vld [vmem:[#allocation8 + $0x28] ss:$16 sps:$4 sm:$0xff]  }
 0x347   : > { %v5041_v50 = vld [vmem:[#allocation8 + $0x22c] ss:$16 sps:$4 sm:$0xff]   ;;  %v5039_v54 = vld [vmem:[#allocation8 + $0x228] ss:$16 sps:$4 sm:$0xff]  }
 0x348   : > { %v2350_v60 = vcombine.low %v2342_v59, %v2349_v25  ;;  %v5044_v55 = vld [vmem:[#allocation8 + $0xc] ss:$16 sps:$4 sm:$0xff]   ;;  %v5042_v24 = vld [vmem:[#allocation8 + $0x8] ss:$16 sps:$4 sm:$0xff]  }
 0x349   : > { %v5047_v53 = vld [vmem:[#allocation8 + $0x20c] ss:$16 sps:$4 sm:$0xff]   ;;  %v5045_v25 = vld [vmem:[#allocation8 + $0x208] ss:$16 sps:$4 sm:$0xff]  }
 0x34a   : > { %v2357_v62 = vrot.slane %v2350_v60, %v5710_v1  ;;  %v5050_v59 = vld [vmem:[#allocation8 + $0x1ec] ss:$16 sps:$4 sm:$0xff]  }
 0x34b   : > { %v5053_v60 = vld [vmem:[#allocation8 + $0x3ec] ss:$16 sps:$4 sm:$0xff]  }
 0x34c   : > { %v2359_v63 = vsub.f32 %v1217_v61, %v2357_v62  ;;  %v5048_v61 = vld [vmem:[#allocation8 + $0x1e8] ss:$16 sps:$4 sm:$0xff]  }
 0x34d   : > { %v5051_v62 = vld [vmem:[#allocation8 + $0x3e8] ss:$16 sps:$4 sm:$0xff]  }
 0x34e   : > { %v2376_v58 = vrot.slane %v2359_v63, %v5653_v33  ;;  %v2384_v3 = vrot.slane %v2359_v63, %v5661_v49  ;;  %v2372_v6 = vrot.slane %v2359_v63, %v5650_v31  ;;  %v2380_v7 = vrot.slane %v2359_v63, %v5658_v45  ;;  %v5056_v63 = vld [vmem:[#allocation8 + $0x1cc] ss:$16 sps:$4 sm:$0xff]  }
 0x350   : > { %v2390_v52 = vadd.f32 %v2376_v58, %v2361_v28  ;;  %v2394_v22 = vadd.f32 %v2376_v58, %v2365_v46  ;;  %v2392_v12 = vadd.f32 %v2384_v3, %v2363_v4  ;;  %v2396_v14 = vadd.f32 %v2384_v3, %v2367_v2  ;;  %v5059_v2 = vld [vmem:[#allocation8 + $0x3cc] ss:$16 sps:$4 sm:$0xff]   ;;  %v5054_v28 = vld [vmem:[#allocation8 + $0x1c8] ss:$16 sps:$4 sm:$0xff]  }
 0x351   : > { %v2389_v13 = vadd.f32 %v2372_v6, %v2360_v57  ;;  %v2393_v15 = vadd.f32 %v2372_v6, %v2364_v8  ;;  %v2391_v30 = vadd.f32 %v2380_v7, %v2362_v16  ;;  %v2395_v17 = vadd.f32 %v2380_v7, %v2366_v27  ;;  %v5057_v46 = vld [vmem:[#allocation8 + $0x3c8] ss:$16 sps:$4 sm:$0xff]   ;;  %v5062_v4 = vld [vmem:[#allocation8 + $0x1ac] ss:$16 sps:$4 sm:$0xff]  }
 0x352   : > { %v2398_v18 = vpack.c.bf16 %v2394_v22, %v2390_v52  ;;  %v2400_v20 = vpack.c.bf16 %v2396_v14, %v2392_v12  ;;  %v5065_v58 = vld [vmem:[#allocation8 + $0x3ac] ss:$16 sps:$4 sm:$0xff]   ;;  %v5060_v3 = vld [vmem:[#allocation8 + $0x1a8] ss:$16 sps:$4 sm:$0xff]  }
 0x353   : > { %v5813_v26 = vpack.c.bf16 %v2393_v15, %v2389_v13  ;;  %v5815_v0 = vpack.c.bf16 %v2395_v17, %v2391_v30  ;;  %v5063_v6 = vld [vmem:[#allocation8 + $0x3a8] ss:$16 sps:$4 sm:$0xff]   ;;  %v5068_v7 = vld [vmem:[#allocation8 + $0x18c] ss:$16 sps:$4 sm:$0xff]  }
 0x354   : > { %3228 = vmatprep.mubr.bf16.mxu0 %v2398_v18  ;;  %3271 = vmatprep.mubr.bf16.mxu1 %v2400_v20  ;;  %v5071_v57 = vld [vmem:[#allocation8 + $0x38c] ss:$16 sps:$4 sm:$0xff]   ;;  %v5066_v8 = vld [vmem:[#allocation8 + $0x188] ss:$16 sps:$4 sm:$0xff]  }
 0x355   : > { %3229 = vmatmul.mubr.bf16.vlgmr.msra.gmra.mxu0 %v5813_v26  ;;  %3272 = vmatmul.mubr.bf16.vlgmr.msra.gmra.mxu1 %v5815_v0  ;;  %v5069_v16 = vld [vmem:[#allocation8 + $0x388] ss:$16 sps:$4 sm:$0xff]   ;;  %v5074_v27 = vld [vmem:[#allocation8 + $0x16c] ss:$16 sps:$4 sm:$0xff]  }
 0x356   : > { %3283 = vmatpush1.bf16.msra.mxu0 %v5000_v21  ;;  %3326 = vmatpush1.bf16.msra.mxu1 %v5003_v23  ;;  %v5077_v52 = vld [vmem:[#allocation8 + $0x36c] ss:$16 sps:$4 sm:$0xff]   ;;  %v5072_v22 = vld [vmem:[#allocation8 + $0x168] ss:$16 sps:$4 sm:$0xff]  }
 0x357   : > { %3314 = vmatprep.mubr.bf16.mxu0 %v2398_v18  ;;  %3357 = vmatprep.mubr.bf16.mxu1 %v2400_v20  ;;  %v5075_v12 = vld [vmem:[#allocation8 + $0x368] ss:$16 sps:$4 sm:$0xff]   ;;  %v5080_v14 = vld [vmem:[#allocation8 + $0x14c] ss:$16 sps:$4 sm:$0xff]  }
 0x358   : > { %3284 = vmatprep.subr.bf16.mxu0 %v5008_v29  ;;  %3327 = vmatprep.subr.bf16.mxu1 %v5011_v9  ;;  %v5083_v13 = vld [vmem:[#allocation8 + $0x34c] ss:$16 sps:$4 sm:$0xff]   ;;  %v5078_v15 = vld [vmem:[#allocation8 + $0x148] ss:$16 sps:$4 sm:$0xff]  }
 0x359   : > { %v5081_v30 = vld [vmem:[#allocation8 + $0x348] ss:$16 sps:$4 sm:$0xff]   ;;  %v5086_v17 = vld [vmem:[#allocation8 + $0x12c] ss:$16 sps:$4 sm:$0xff]  }
 0x35a   : > { %3285 = vmatpush1.bf16.msra.mxu0 %v5006_v11  ;;  %3328 = vmatpush1.bf16.msra.mxu1 %v5009_v34  ;;  %v5089_v18 = vld [vmem:[#allocation8 + $0x32c] ss:$16 sps:$4 sm:$0xff]   ;;  %v5084_v20 = vld [vmem:[#allocation8 + $0x128] ss:$16 sps:$4 sm:$0xff]  }
 0x35b   : > { %3286 = vmatprep.subr.bf16.mxu0 %v5014_v19  ;;  %3329 = vmatprep.subr.bf16.mxu1 %v5017_v35  ;;  %v5087_v21 = vld [vmem:[#allocation8 + $0x328] ss:$16 sps:$4 sm:$0xff]   ;;  %v5092_v23 = vld [vmem:[#allocation8 + $0x10c] ss:$16 sps:$4 sm:$0xff]  }
 0x35c   : > { %v5095_v29 = vld [vmem:[#allocation8 + $0x30c] ss:$16 sps:$4 sm:$0xff]   ;;  %v5090_v9 = vld [vmem:[#allocation8 + $0x108] ss:$16 sps:$4 sm:$0xff]  }
 0x35d   : > { %v5093_v11 = vld [vmem:[#allocation8 + $0x308] ss:$16 sps:$4 sm:$0xff]  }
 0x35e   : > { %3287 = vmatpush1.bf16.msra.mxu0 %v5012_v5  ;;  %3330 = vmatpush1.bf16.msra.mxu1 %v5015_v10  ;;  %v5096_v34 = vld [vmem:[#allocation10 + $0x78] sm:$0xff]   ;;  %v5100_v10 = vld [vmem:[#allocation10 + $0x70] sm:$0xff]  }
 0x35f   : > { %3288 = vmatprep.subr.bf16.mxu0 %v5020_v32  ;;  %3331 = vmatprep.subr.bf16.mxu1 %v5023_v37  ;;  %v5097_v19 = vld [vmem:[#allocation10 + $0xf8] sm:$0xff]   ;;  %v5101_v32 = vld [vmem:[#allocation10 + $0xf0] sm:$0xff]  }
 0x360   : > { %v5098_v35 = vld [vmem:[#allocation10 + $0x38] sm:$0xff]   ;;  %v5102_v37 = vld [vmem:[#allocation10 + $0x30] sm:$0xff]  }
 0x361   : > { %v5099_v5 = vld [vmem:[#allocation10 + $0xb8] sm:$0xff]  }
 0x362   : > { %3289 = vmatpush1.bf16.msra.mxu0 %v5018_v36  ;;  %3332 = vmatpush1.bf16.msra.mxu1 %v5021_v38  ;;  %v5103_v36 = vld [vmem:[#allocation10 + $0xb0] sm:$0xff]  }
 0x363   : > { %3290 = vmatprep.subr.bf16.mxu0 %v5026_v39  ;;  %3333 = vmatprep.subr.bf16.mxu1 %v5029_v40  ;;  %v5105_v39 = vld [vmem:[#allocation10 + $0xe8] sm:$0xff]  }
 0x364   : > { %v5107_v40 = vld [vmem:[#allocation10 + $0xa8] sm:$0xff]  }
 0x366   : > { %3291 = vmatpush1.bf16.msra.mxu0 %v5024_v41  ;;  %3334 = vmatpush1.bf16.msra.mxu1 %v5027_v56  ;;  %v5108_v56 = vld [vmem:[#allocation10 + $0x60] sm:$0xff]  }
 0x367   : > { %3292 = vmatprep.subr.bf16.mxu0 %v5032_v42  ;;  %3335 = vmatprep.subr.bf16.mxu1 %v5035_v43  ;;  %v5109_v42 = vld [vmem:[#allocation10 + $0xe0] sm:$0xff]  }
 0x368   : > { %v5110_v43 = vld [vmem:[#allocation10 + $0x20] sm:$0xff]  }
 0x36a   : > { %3293 = vmatpush1.bf16.msra.mxu0 %v5030_v44  ;;  %3336 = vmatpush1.bf16.msra.mxu1 %v5033_v47  ;;  %v5111_v44 = vld [vmem:[#allocation10 + $0xa0] sm:$0xff]  }
 0x36b   : > { %3294 = vmatprep.subr.bf16.mxu0 %v5038_v48  ;;  %3337 = vmatprep.subr.bf16.mxu1 %v5041_v50  ;;  %v5112_v50 = vld [vmem:[#allocation10 + $0x58] sm:$0xff]  }
 0x36e   : > { %3295 = vmatpush1.bf16.msra.mxu0 %v5036_v51  ;;  %3338 = vmatpush1.bf16.msra.mxu1 %v5039_v54  ;;  %v5113_v51 = vld [vmem:[#allocation10 + $0xd8] sm:$0xff]  }
 0x36f   : > { %3296 = vmatprep.subr.bf16.mxu0 %v5044_v55  ;;  %3339 = vmatprep.subr.bf16.mxu1 %v5047_v53  ;;  %v5114_v54 = vld [vmem:[#allocation10 + $0x18] sm:$0xff]  }
 0x370   : > { %v5115_v55 = vld [vmem:[#allocation10 + $0x98] sm:$0xff]  }
 0x372   : > { %3297 = vmatpush1.bf16.msra.mxu0 %v5042_v24  ;;  %3340 = vmatpush1.bf16.msra.mxu1 %v5045_v25  ;;  %v5116_v24 = vld [vmem:[#allocation10 + $0x50] sm:$0xff]  }
 0x373   : > { %3298 = vmatprep.subr.bf16.mxu0 %v5050_v59  ;;  %3341 = vmatprep.subr.bf16.mxu1 %v5053_v60  ;;  %v5117_v25 = vld [vmem:[#allocation10 + $0xd0] sm:$0xff]  }
 0x374   : > { %v5118_v59 = vld [vmem:[#allocation10 + $0x10] sm:$0xff]  }
 0x375   : > { %v5119_v60 = vld [vmem:[#allocation10 + $0x90] sm:$0xff]  }
 0x376   : > { %3299 = vmatpush2.bf16.msra.mxu0 %v5048_v61  ;;  %3342 = vmatpush2.bf16.msra.mxu1 %v5051_v62  ;;  %v2402_v61 = vld [vmem:[#allocation11 + $0x6] ss:$8 sm:$0xf] }
 0x377   : > { %3300 = vmatprep.subr.bf16.mxu0 %v5056_v63  ;;  %3343 = vmatprep.subr.bf16.mxu1 %v5059_v2  ;;  %v5120_v63 = vld [vmem:[#allocation10 + $0x48] sm:$0xff]  }
 0x378   : > { %v5121_v2 = vld [vmem:[#allocation10 + $0xc8] sm:$0xff]  }
 0x37a   : > { %3301 = vmatpush2.bf16.msra.mxu0 %v5054_v28  ;;  %3344 = vmatpush2.bf16.msra.mxu1 %v5057_v46  ;;  %v2543_v28 = vrot.slane %v2402_v61, %v5653_v33 }
 0x37b   : > { %3302 = vmatprep.subr.bf16.mxu0 %v5062_v4  ;;  %3345 = vmatprep.subr.bf16.mxu1 %v5065_v58  ;;  %v2539_v4 = vrot.slane %v2402_v61, %v5650_v31 }
 0x37e   : > { %3303 = vmatpush2.bf16.msra.mxu0 %v5060_v3  ;;  %3346 = vmatpush2.bf16.msra.mxu1 %v5063_v6  ;;  %v5122_v3 = vld [vmem:[#allocation10 + $0x8] sm:$0xff]  }
 0x37f   : > { %3304 = vmatprep.subr.bf16.mxu0 %v5068_v7  ;;  %3347 = vmatprep.subr.bf16.mxu1 %v5071_v57  ;;  %v5123_v6 = vld [vmem:[#allocation10 + $0x88] sm:$0xff]   ;;  %v5124_v7 = vld [vmem:[#allocation10 + $0x40] sm:$0xff]  }
 0x380   : > { %v5125_v57 = vld [vmem:[#allocation10 + $0xc0] sm:$0xff]  }
 0x382   : > { %3305 = vmatpush2.bf16.msra.mxu0 %v5066_v8  ;;  %3348 = vmatpush2.bf16.msra.mxu1 %v5069_v16 }
 0x383   : > { %3306 = vmatprep.subr.bf16.mxu0 %v5074_v27  ;;  %3349 = vmatprep.subr.bf16.mxu1 %v5077_v52 }
 0x386   : > { %3307 = vmatpush2.bf16.msra.mxu0 %v5072_v22  ;;  %3350 = vmatpush2.bf16.msra.mxu1 %v5075_v12  ;;  %v5126_v12 = vld [vmem:[#allocation10] sm:$0xff]  }
 0x387   : > { %3308 = vmatprep.subr.bf16.mxu0 %v5080_v14  ;;  %3351 = vmatprep.subr.bf16.mxu1 %v5083_v13  ;;  %v5127_v14 = vld [vmem:[#allocation10 + $0x80] sm:$0xff]  }
 0x38a   : > { %3309 = vmatpush2.bf16.msra.mxu0 %v5078_v15  ;;  %3352 = vmatpush2.bf16.msra.mxu1 %v5081_v30 }
 0x38b   : > { %3310 = vmatprep.subr.bf16.mxu0 %v5086_v17  ;;  %3353 = vmatprep.subr.bf16.mxu1 %v5089_v18 }
 0x38e   : > { %3311 = vmatpush2.bf16.msra.mxu0 %v5084_v20  ;;  %3354 = vmatpush2.bf16.msra.mxu1 %v5087_v21 }
 0x38f   : > { %3312 = vmatprep.subr.bf16.mxu0 %v5092_v23  ;;  %3355 = vmatprep.subr.bf16.mxu1 %v5095_v29 }
 0x392   : > { %3313 = vmatpush2.bf16.msra.mxu0 %v5090_v9  ;;  %3356 = vmatpush2.bf16.msra.mxu1 %v5093_v11 }
 0x393   : > { %4450 = vmatprep.subr.bf16.mxu0 %v5096_v34  ;;  %4472 = vmatprep.subr.bf16.mxu1 %v5097_v19 }
 0x395   : > { %3315 = vmatmul.mubr.bf16.vlgmr.msra.gmra.mxu0 %v5813_v26  ;;  %3358 = vmatmul.mubr.bf16.vlgmr.msra.gmra.mxu1 %v5815_v0  ;;  %v5104_v26 = vld [vmem:[#allocation10 + $0x68] sm:$0xff]  }
 0x396   : > { %4451 = vmatpush3.bf16.msra.mxu0 %v5098_v35  ;;  %4473 = vmatpush3.bf16.msra.mxu1 %v5099_v5  ;;  %v5106_v0 = vld [vmem:[#allocation10 + $0x28] sm:$0xff]  }
 0x397   : > { %4452 = vmatprep.subr.bf16.mxu0 %v5100_v10  ;;  %4474 = vmatprep.subr.bf16.mxu1 %v5101_v32 }
 0x39a   : > { %4453 = vmatpush3.bf16.msra.mxu0 %v5102_v37  ;;  %4475 = vmatpush3.bf16.msra.mxu1 %v5103_v36 }
 0x39b   : > { %4454 = vmatprep.subr.bf16.mxu0 %v5104_v26  ;;  %4476 = vmatprep.subr.bf16.mxu1 %v5105_v39  ;;  %v2547_v39 = vrot.slane %v2402_v61, %v5658_v45 }
 0x39e   : > { %4455 = vmatpush3.bf16.msra.mxu0 %v5106_v0  ;;  %4477 = vmatpush3.bf16.msra.mxu1 %v5107_v40  ;;  %v2551_v40 = vrot.slane %v2402_v61, %v5661_v49 }
 0x39f   : > { %4456 = vmatprep.subr.bf16.mxu0 %v5108_v56  ;;  %4478 = vmatprep.subr.bf16.mxu1 %v5109_v42 }
 0x3a2   : > { %4457 = vmatpush3.bf16.msra.mxu0 %v5110_v43  ;;  %4479 = vmatpush3.bf16.msra.mxu1 %v5111_v44 }
 0x3a3   : > { %4458 = vmatprep.subr.bf16.mxu0 %v5112_v50  ;;  %4480 = vmatprep.subr.bf16.mxu1 %v5113_v51 }
 0x3a6   : > { %4459 = vmatpush3.bf16.msra.mxu0 %v5114_v54  ;;  %4481 = vmatpush3.bf16.msra.mxu1 %v5115_v55 }
 0x3a7   : > { %4460 = vmatprep.subr.bf16.mxu0 %v5116_v24  ;;  %4482 = vmatprep.subr.bf16.mxu1 %v5117_v25 }
 0x3aa   : > { %4461 = vmatpush3.bf16.msra.mxu0 %v5118_v59  ;;  %4483 = vmatpush3.bf16.msra.mxu1 %v5119_v60 }
 0x3ab   : > { %4462 = vmatprep.subr.bf16.mxu0 %v5120_v63  ;;  %4484 = vmatprep.subr.bf16.mxu1 %v5121_v2 }
 0x3ae   : > { %4463 = vmatpush3.bf16.msra.mxu0 %v5122_v3  ;;  %4485 = vmatpush3.bf16.msra.mxu1 %v5123_v6 }
 0x3af   : > { %4464 = vmatprep.subr.bf16.mxu0 %v5124_v7  ;;  %4486 = vmatprep.subr.bf16.mxu1 %v5125_v57 }
 0x3b2   : > { %4465 = vmatpush3.bf16.msra.mxu0 %v5126_v12  ;;  %4487 = vmatpush3.bf16.msra.mxu1 %v5127_v14 }
 0x415   : > { %v3230_v38 = vpop.f32.mrf.mxu0  ;;  %v3273_v47 = vpop.f32.mrf.mxu1 }
 0x416   : > { %v3231_v52 = vadd.f32 %v3230_v38, %v2539_v4 }
 0x417   : > { %v3232_v41 = vpop.f32.mrf.mxu0  ;;  %v3275_v53 = vpop.f32.mrf.mxu1 }
 0x418   : > { %v3233_v8 = vadd.f32 %v3232_v41, %v2543_v28  ;;  %v3274_v30 = vadd.f32 %v3273_v47, %v3231_v52 }
 0x419   : > { %v3234_v48 = vpop.f32.mrf.mxu0  ;;  %v3277_v46 = vpop.f32.mrf.mxu1 }
 0x41a   : > { %v3235_v16 = vadd.f32 %v3234_v48, %v2539_v4  ;;  %v3276_v13 = vadd.f32 %v3275_v53, %v3233_v8  ;;  %v5829_v21 = vmax.f32 %v3274_v30, 0.0 }
 0x41b   : > { %v3236_v62 = vpop.f32.mrf.mxu0  ;;  %v3279_v27 = vpop.f32.mrf.mxu1 }
 0x41c   : > { %v3237_v58 = vadd.f32 %v3236_v62, %v2543_v28  ;;  %v3278_v15 = vadd.f32 %v3277_v46, %v3235_v16  ;;  %v5825_v18 = vmax.f32 %v3276_v13, 0.0 }
 0x41e   : > { %v3280_v22 = vadd.f32 %v3279_v27, %v3237_v58  ;;  %v5827_v20 = vmax.f32 %v3278_v15, 0.0 }
 0x420   : > { %v5823_v17 = vmax.f32 %v3280_v22, 0.0  ;;  %v3376_v29 = vadd.f32 %v5827_v20, %v5829_v21 }
 0x422   : > { %v3383_v23 = vadd.f32 %v5823_v17, %v5825_v18  ;;  %v3377_v11 = vrot.slane %v3376_v29, 4 }
 0x424   : > { %v3384_v9 = vrot.slane %v3383_v23, 4  ;;  %v3378_v19 = vadd.f32 %v3377_v11, %v3376_v29 }
 0x426   : > { %v3385_v34 = vadd.f32 %v3384_v9, %v3383_v23  ;;  %v3379_v5 = vrot.slane %v3378_v19, 2 }
 0x428   : > { %v3386_v35 = vrot.slane %v3385_v34, 2  ;;  %v3380_v32 = vadd.f32 %v3379_v5, %v3378_v19 }
 0x42a   : > { %v3387_v10 = vadd.f32 %v3386_v35, %v3385_v34  ;;  %v3381_v36 = vrot.slane %v3380_v32, 1 }
 0x42c   : > { %v3388_v37 = vrot.slane %v3387_v10, 1  ;;  %v3382_v26 = vadd.f32 %v3381_v36, %v3380_v32 }
 0x42e   : > { %v3389_v38 = vadd.f32 %v3388_v37, %v3387_v10  ;;  %v5839_v41 = vmul.f32 0.0625, %v3382_v26 }
 0x430   : > { %v5836_v0 = vmul.f32 0.0625, %v3389_v38  ;;  %v3408_v54 = vsub.f32 %v5829_v21, %v5839_v41  ;;  %v3412_v55 = vsub.f32 %v5827_v20, %v5839_v41 }
 0x432   : > { %v3409_v44 = vsub.f32 %v5825_v18, %v5836_v0  ;;  %v3413_v50 = vsub.f32 %v5823_v17, %v5836_v0  ;;  %v3416_v46 = vmul.f32 %v3408_v54, %v3408_v54  ;;  %v3420_v4 = vmul.f32 %v3412_v55, %v3412_v55 }
 0x434   : > { %v3417_v60 = vmul.f32 %v3409_v44, %v3409_v44  ;;  %v3421_v62 = vmul.f32 %v3413_v50, %v3413_v50  ;;  %v3424_v52 = vadd.f32 %v3420_v4, %v3416_v46 }
 0x436   : > { %v3431_v57 = vadd.f32 %v3421_v62, %v3417_v60  ;;  %v3425_v30 = vrot.slane %v3424_v52, 4 }
 0x438   : > { %v3432_v14 = vrot.slane %v3431_v57, 4  ;;  %v3426_v19 = vadd.f32 %v3425_v30, %v3424_v52 }
 0x43a   : > { %v3433_v9 = vadd.f32 %v3432_v14, %v3431_v57  ;;  %v3427_v36 = vrot.slane %v3426_v19, 2 }
 0x43c   : > { %v3434_v10 = vrot.slane %v3433_v9, 2 }
 0x455   : > { %v3316_v56 = vpop.f32.mrf.mxu0  ;;  %v3359_v42 = vpop.f32.mrf.mxu1 }
 0x456   : > { %v3317_v43 = vadd.f32 %v3316_v56, %v2547_v39 }
 0x457   : > { %v3318_v47 = vpop.f32.mrf.mxu0  ;;  %v3361_v48 = vpop.f32.mrf.mxu1 }
 0x458   : > { %v3319_v51 = vadd.f32 %v3318_v47, %v2551_v40  ;;  %v3360_v25 = vadd.f32 %v3359_v42, %v3317_v43  ;;  %v3428_v43 = vadd.f32 %v3427_v36, %v3426_v19  ;;  %v2404_v36 = vld [vmem:[#allocation11 + $0x7] ss:$8 sm:$0xf] }
 0x459   : > { %v3320_v53 = vpop.f32.mrf.mxu0  ;;  %v3363_v24 = vpop.f32.mrf.mxu1 }
 0x45a   : > { %v3321_v59 = vadd.f32 %v3320_v53, %v2547_v39  ;;  %v3362_v63 = vadd.f32 %v3361_v48, %v3319_v51  ;;  %v5849_v3 = vmax.f32 %v3360_v25, 0.0  ;;  %v3435_v39 = vadd.f32 %v3434_v10, %v3433_v9 }
 0x45b   : > { %v3322_v61 = vpop.f32.mrf.mxu0  ;;  %v3365_v58 = vpop.f32.mrf.mxu1 }
 0x45c   : > { %v3364_v2 = vadd.f32 %v3363_v24, %v3321_v59  ;;  %v3323_v28 = vadd.f32 %v3322_v61, %v2551_v40  ;;  %v5853_v8 = vmax.f32 %v3362_v63, 0.0  ;;  %v3436_v51 = vrot.slane %v3435_v39, 1 }
 0x45d   : > { %v3429_v24 = vrot.slane %v3428_v43, 1 }
 0x45e   : > { %v5851_v6 = vmax.f32 %v3364_v2, 0.0  ;;  %v3366_v7 = vadd.f32 %v3365_v58, %v3323_v28  ;;  %v3437_v60 = vadd.f32 %v3436_v51, %v3435_v39 }
 0x45f   : > { %v3430_v63 = vadd.f32 %v3429_v24, %v3428_v43 }
 0x460   : > { %v3390_v16 = vadd.f32 %v5851_v6, %v5849_v3  ;;  %v5857_v27 = vmax.f32 %v3366_v7, 0.0  ;;  %v3453_v46 = vmul.f32 0.0625, %v3437_v60 }
 0x461   : > { %v3452_v7 = vmul.f32 0.0625, %v3430_v63 }
 0x462   : > { %v3391_v22 = vrot.slane %v3390_v16, 4  ;;  %v3397_v12 = vadd.f32 %v5857_v27, %v5853_v8  ;;  %v3457_v52 = vadd.f32 1e-05, %v3453_v46 }
 0x463   : > { %v3456_v14 = vadd.f32 1e-05, %v3452_v7 }
 0x464   : > { %v3392_v13 = vadd.f32 %v3391_v22, %v3390_v16  ;;  %v3398_v15 = vrot.slane %v3397_v12, 4  ;;  %5144 = vrsqrt.f32 %v3457_v52 }
 0x465   : > { %5146 = vrsqrt.f32 %v3456_v14 }
 0x466   : > { %v3393_v23 = vrot.slane %v3392_v13, 2  ;;  %v3399_v29 = vadd.f32 %v3398_v15, %v3397_v12 }
 0x468   : > { %v3394_v11 = vadd.f32 %v3393_v23, %v3392_v13  ;;  %v3400_v34 = vrot.slane %v3399_v29, 2 }
 0x46a   : > { %v3395_v35 = vrot.slane %v3394_v11, 1  ;;  %v3401_v5 = vadd.f32 %v3400_v34, %v3399_v29 }
 0x46c   : > { %v3396_v32 = vadd.f32 %v3395_v35, %v3394_v11  ;;  %v3402_v37 = vrot.slane %v3401_v5, 1 }
 0x46e   : > { %v3406_v38 = vmul.f32 0.0625, %v3396_v32  ;;  %v3403_v26 = vadd.f32 %v3402_v37, %v3401_v5 }
 0x470   : > { %v3410_v40 = vsub.f32 %v5849_v3, %v3406_v38  ;;  %v3414_v56 = vsub.f32 %v5851_v6, %v3406_v38  ;;  %v3407_v42 = vmul.f32 0.0625, %v3403_v26 }
 0x471   : > { %v5145_v9 = vpop.eup %5144 }
 0x472   : > { %v3418_v44 = vmul.f32 %v3410_v40, %v3410_v40  ;;  %v3422_v47 = vmul.f32 %v3414_v56, %v3414_v56  ;;  %v3411_v48 = vsub.f32 %v5853_v8, %v3407_v42  ;;  %v3415_v50 = vsub.f32 %v5857_v27, %v3407_v42  ;;  %v5147_v11 = vpop.eup %5146 }
 0x473   : > { %v3468_v19 = vcombine.low %v5147_v11, %v5145_v9 }
 0x474   : > { %v3438_v54 = vadd.f32 %v3422_v47, %v3418_v44  ;;  %v3419_v55 = vmul.f32 %v3411_v48, %v3411_v48  ;;  %v3423_v53 = vmul.f32 %v3415_v50, %v3415_v50 }
 0x475   : > { %v3476_v10 = vrot.slane %v3468_v19, %v5710_v1 }
 0x476   : > { %v3439_v25 = vrot.slane %v3438_v54, 4  ;;  %v3445_v59 = vadd.f32 %v3423_v53, %v3419_v55 }
 0x478   : > { %v3440_v61 = vadd.f32 %v3439_v25, %v3438_v54  ;;  %v3446_v62 = vrot.slane %v3445_v59, 4 }
 0x47a   : > { %v3441_v2 = vrot.slane %v3440_v61, 2  ;;  %v3447_v28 = vadd.f32 %v3446_v62, %v3445_v59  ;;  %v2406_v59 = vld [vmem:[#allocation11 + $0x20] ss:$8 sm:$0xf] }
 0x47c   : > { %v3442_v4 = vadd.f32 %v3441_v2, %v3440_v61  ;;  %v3448_v58 = vrot.slane %v3447_v28, 2 }
 0x47e   : > { %v3443_v57 = vrot.slane %v3442_v4, 1  ;;  %v3449_v16 = vadd.f32 %v3448_v58, %v3447_v28 }
 0x480   : > { %v3444_v22 = vadd.f32 %v3443_v57, %v3442_v4  ;;  %v3450_v12 = vrot.slane %v3449_v16, 1 }
 0x482   : > { %v3454_v13 = vmul.f32 0.0625, %v3444_v22  ;;  %v3451_v15 = vadd.f32 %v3450_v12, %v3449_v16 }
 0x484   : > { %v3458_v30 = vadd.f32 1e-05, %v3454_v13  ;;  %v3455_v23 = vmul.f32 0.0625, %v3451_v15 }
 0x486   : > { %v3459_v29 = vadd.f32 1e-05, %v3455_v23  ;;  %5148 = vrsqrt.f32 %v3458_v30 }
 0x488   : > { %5150 = vrsqrt.f32 %v3459_v29 }
 0x493   : > { %v5149_v34 = vpop.eup %5148 }
 0x495   : > { %v5151_v35 = vpop.eup %5150 }
 0x496   : > { %v3469_v5 = vcombine.low %v5149_v34, %v5151_v35 }
 0x498   : > { %v3483_v32 = vrot.slane %v3469_v5, %v5710_v1 }
 0x49a   : > { %v3484_v37 = vcombine.low %v3476_v10, %v3483_v32 }
 0x49c   : > { %v3491_v26 = vrot.slane %v3484_v37, %v5710_v1 }
 0x49e   : > { %v3493_v39 = vmul.f32 %v3491_v26, %v2404_v36 }
 0x4a0   : > { %v3506_v40 = vrot.slane %v3493_v39, %v5658_v45  ;;  %v3510_v56 = vrot.slane %v3493_v39, %v5661_v49  ;;  %v3498_v43 = vrot.slane %v3493_v39, %v5650_v31  ;;  %v3502_v44 = vrot.slane %v3493_v39, %v5653_v33 }
 0x4a2   : > { %v3517_v47 = vmul.f32 %v3506_v40, %v3406_v38  ;;  %v3518_v48 = vmul.f32 %v3510_v56, %v3407_v42  ;;  %v3515_v50 = vmul.f32 %v3498_v43, %v5839_v41  ;;  %v3516_v51 = vmul.f32 %v3502_v44, %v5836_v0 }
 0x4a3   : > { %v3556_v62 = vmul.f32 %v3510_v56, %v5857_v27  ;;  %v3550_v38 = vmul.f32 %v3502_v44, %v5825_v18  ;;  %v3554_v42 = vmul.f32 %v3502_v44, %v5823_v17  ;;  %v3552_v41 = vmul.f32 %v3510_v56, %v5853_v8 }
 0x4a4   : > { %v3524_v54 = vcombine.low %v3517_v47, %v3518_v48  ;;  %v3523_v55 = vcombine.low %v3515_v50, %v3516_v51  ;;  %v3549_v46 = vmul.f32 %v3498_v43, %v5829_v21  ;;  %v3551_v27 = vmul.f32 %v3506_v40, %v5849_v3  ;;  %v3654_v3 = vld [vmem:[#allocation11 + $0x21] ss:$0 sm:$0xff] }
 0x4a5   : > { %v3555_v18 = vmul.f32 %v3506_v40, %v5851_v6 }
 0x4a6   : > { %v3538_v53 = vrot.slane %v3524_v54, %v5710_v1  ;;  %v3531_v24 = vrot.slane %v3523_v55, %v5710_v1 }
 0x4a8   : > { %v3539_v25 = vcombine.low %v3531_v24, %v3538_v53 }
 0x4aa   : > { %v3546_v60 = vrot.slane %v3539_v25, %v5710_v1  ;;  %v3553_v1 = vmul.f32 %v3498_v43, %v5827_v20 }
 0x4ac   : > { %v3548_v61 = vsub.f32 %v2406_v59, %v3546_v60 }
 0x4ae   : > { %v3565_v0 = vrot.slane %v3548_v61, %v5653_v33  ;;  %v3573_v63 = vrot.slane %v3548_v61, %v5661_v49  ;;  %v3561_v2 = vrot.slane %v3548_v61, %v5650_v31  ;;  %v3569_v28 = vrot.slane %v3548_v61, %v5658_v45 }
 0x4b0   : > { %v3579_v4 = vadd.f32 %v3565_v0, %v3550_v38  ;;  %v3583_v17 = vadd.f32 %v3565_v0, %v3554_v42  ;;  %v3581_v58 = vadd.f32 %v3573_v63, %v3552_v41  ;;  %v3585_v8 = vadd.f32 %v3573_v63, %v3556_v62 }
 0x4b1   : > { %v3578_v7 = vadd.f32 %v3561_v2, %v3549_v46  ;;  %v3582_v33 = vadd.f32 %v3561_v2, %v3553_v1  ;;  %v3580_v49 = vadd.f32 %v3569_v28, %v3551_v27  ;;  %v3584_v57 = vadd.f32 %v3569_v28, %v3555_v18 }
 0x4b2   : > { %v3587_v31 = vpack.c.bf16 %v3583_v17, %v3579_v4  ;;  %v3589_v16 = vpack.c.bf16 %v3585_v8, %v3581_v58 }
 0x4b3   : > { %v3586_v45 = vpack.c.bf16 %v3582_v33, %v3578_v7  ;;  %v3588_v52 = vpack.c.bf16 %v3584_v57, %v3580_v49 }
 0x4b4   : > { %3879 = vmatprep.mubr.bf16.mxu0 %v3587_v31  ;;  %3920 = vmatprep.mubr.bf16.mxu1 %v3589_v16 }
 0x4b5   : > { %3880 = vmatmul.mubr.bf16.vlgmr.msra.gmra.mxu0 %v3586_v45  ;;  %3921 = vmatmul.mubr.bf16.vlgmr.msra.gmra.mxu1 %v3588_v52 }
 0x575   : > { %v4466_v20 = vpop.f32.mrf.mxu0  ;;  %v4488_v21 = vpop.f32.mrf.mxu1 }
 0x577   : > { %v4467_v6 = vpop.f32.mrf.mxu0  ;;  %v4489_v22 = vpop.f32.mrf.mxu1 }
 0x578   : > { %v4468_v12 = vadd.f32 %v4467_v6, %v4466_v20  ;;  %v4490_v30 = vadd.f32 %v4489_v22, %v4488_v21 }
 0x579   : > { %v4469_v14 = vpop.f32.mrf.mxu0  ;;  %v4491_v13 = vpop.f32.mrf.mxu1 }
 0x57a   : > { %v3882_v15 = vadd.f32 %v4468_v12, %v3654_v3 }
 0x57b   : > { %v4470_v23 = vpop.f32.mrf.mxu0  ;;  %v4492_v29 = vpop.f32.mrf.mxu1 }
 0x57c   : > { %v3923_v9 = vadd.f32 %v4490_v30, %v3882_v15  ;;  %v4471_v11 = vadd.f32 %v4470_v23, %v4469_v14  ;;  %v4493_v19 = vadd.f32 %v4492_v29, %v4491_v13 }
 0x57e   : > { %3929 = vst [vmem:[%s342_s7] sm:$0xff] %v3923_v9  ;;  %v3885_v34 = vadd.f32 %v4471_v11, %v3654_v3 }
 0x580   : > { %v3926_v35 = vadd.f32 %v4493_v19, %v3885_v34 }
 0x582   : > { %3930 = vst [vmem:[%s342_s7 + $0x8] sm:$0xff] %v3926_v35 }
 0x583   : > { %5323 = shalt.err (!%p5320_p3)
}
 0x584   : > { %s5324_s13 = scalar_lea.hbm %s5896_s14, 256  ;;  %s5328_s28 = scalar_lea.hbm %s5945_s6, 512 }
 0x585   : > { %p5325_p4 = scmp.ne.s32.totalorder %s5896_s14, %s5324_s13  ;;  %p5329_p5 = scmp.lt.s32.totalorder %s5896_s14, %s5945_s6 }
 0x586   : > { %p5330_p2 = scmp.lt.s32.totalorder %s5328_s28, %s5324_s13 }
 0x587   : > { %p5326_p12 = pnand %p5325_p4, %p5965_p11 }
 0x588   : > { %p5331_p8 = por %p5330_p2, %p5329_p5 }
 0x589   : > { %p5327_p6 = pneg %p5326_p12 }
 0x58b   : > { %p5332_p10 = pnand %p5331_p8, %p5327_p6 }
 0x58d   : > { %5335 = shalt.err (!%p5332_p10)
}
 0x58e   : > { %s5405_s17 = smov 128   ;;  %s5406_s18 = smov 8  }
 0x58f   : > { %4519 = dma.vmem_to_hbm [thread:$0]  (%p5965_p11), %s5891_s9, 256, %s5896_s14, %s3932_s10, %s5405_s17, %s5405_s17, %s5406_s18  }
 0x590 PF: > { %s3960_s25 = sand.u32 1, %s5374_s21   ;;  %p5966_p13 = scmp.ne.s32.totalorder %s5955_s11, 0 }
 0x591   : > { %p5967_p0 = scmp.ge.s32.totalorder %s5386_s24, 2  ;;  %s3961_s27 = scalar_lea.sflag [#allocation4], %s3960_s25 }
 0x593   : > { %p4542_p7 = pnand %p5967_p0, %p5966_p13 }
 0x595   : > { %p4543_p9 = pneg %p4542_p7 }
 0x597   : > { %5369 = dma.done.wait (%p4543_p9), %s3961_s27, 256  }
 0x598   : > { %5371 = vsyncadd (%p4543_p9), %s3961_s27, 4294967040  ;;  %p22_p1 = scmp.ge.s32.totalorder %s5538_s20, 4   ;;  %s5968_s21 = smov %s5378_s22 }
 0x599   : > { %s5969_s22 = smov %s5382_s23  ;;  %s5970_s23 = smov %s5550_s29 }
 0x59a   : > { %s5971_s24 = smov %s5538_s20  ;;  %24 = sbr.rel (!%p22_p1) target bundleno = 8 (0x8), region = 117 }
 0x59f   :  { %3966 = vsyncpa [#allocation3], 1 }
 0x5a0   :  { %3968 = vsyncpa [#allocation3 + $0x1], 1 }
 0x5a1   :  { %3969 = vsyncpa [#allocation6], 1 }
 0x5a2   :  { %3970 = vsyncpa [#allocation9], 1 }
 0x5a3   :  { %3971 = vsyncpa [#allocation12], 1 }
 0x5a4   :  { %3972 = vsyncpa [#allocation4], 1 }
 0x5a5   :  { %3974 = vsyncpa [#allocation4 + $0x1], 1 }

</bundles_post_ra>
